<compile_context>
chip_gen: v7x
topology: tpu7x:2x2x1
jax: 0.10.0
libtpu: 0.0.40
codegen_flags: <defaults>
</compile_context>

<pallas_src>
import functools
import math

import jax
import jax.numpy as jnp
from jax import lax
from jax.experimental import pallas as pl
from jax.experimental.pallas import tpu as pltpu

_EPS = 1e-5


# ------------------------------ fused kernel ------------------------------

def _ghost_bottleneck_kernel(x_ref, m_ref, w1_ref, b1_ref, wc1_ref, bc1_ref,
                             w2_ref, b2_ref, wc2_ref, bc2_ref, o_ref,
                             *, W, ks):
    x = x_ref[...]          # (Cin, L) f32, lane-dense, L = images_per_block * H*W
    masks = m_ref[...]      # (ks*ks, L) f32 {0,1} edge masks (precomputed on host)
    L = x.shape[1]
    r = ks // 2

    def ghost(inp, w, b, wc, bc, relu):
        # Stage 1: 1x1 conv + folded BN + group replication as ONE MXU matmul.
        slab = jnp.dot(w, inp, precision=lax.Precision.HIGHEST,
                       preferred_element_type=jnp.float32) + b
        if relu:
            slab = jnp.maximum(slab, 0.0)
        # Stage 2: 3x3 depthwise conv + folded BN on the full-width slab.
        # Per tap: roll (XLU) -> mask (VPU mul) -> weight-column FMA (VPU); only
        # the accumulator and one shifted slab are live at any time.
        acc = jnp.zeros_like(slab)
        t = 0
        for di in range(-r, r + 1):
            for dj in range(-r, r + 1):
                s = di * W + dj                              # out[p] = slab[p+s]
                if s == 0:
                    v = slab                                 # center tap: no mask
                else:
                    v = pltpu.roll(slab, shift=(-s) % L, axis=1) * masks[t:t + 1, :]
                acc = acc + wc[:, t:t + 1] * v
                t += 1
        acc = acc + bc
        return jnp.maximum(acc, 0.0) if relu else acc

    h1 = ghost(x, w1_ref[...], b1_ref[...], wc1_ref[...], bc1_ref[...], relu=True)
    h2 = ghost(h1, w2_ref[...], b2_ref[...], wc2_ref[...], bc2_ref[...], relu=False)
    # Identity shortcut fused into one full-block, lane-dense, unmasked store.
    o_ref[...] = h2 + x


# ----------------------------- wrapper / params -----------------------------

def _fold_bn(gamma, beta, mean, var, eps=_EPS):
    scale = gamma / jnp.sqrt(var + eps)
    return scale, beta - mean * scale


def _prep_ghost_params(p, ks=3):
    """Fold inference BN, group replication, concat[:oup] slice and the identity
    pass-through rows into two weight tables consumed by the fused kernel."""
    init, ratio, oup = p['init_channels'], p['ratio'], p['oup']
    mult, keep = ratio - 1, oup - init
    s1, b1 = _fold_bn(*p['bn1'])
    s2, b2 = _fold_bn(*p['bn2'])

    # primary 1x1 conv, BN folded: (init, cin)
    w_pw = (p['primary_w'][:, :, 0, 0] * s1[:, None]).astype(jnp.float32)
    # replication of group g -> new-channel rows (done on weights, so the MXU
    # matmul directly emits [primary rows ; replicated rows]).
    rep = jnp.asarray([j // mult for j in range(keep)], dtype=jnp.int32)
    w_comb = jnp.concatenate([w_pw, w_pw[rep]], axis=0)                   # (oup, cin)
    b_comb = jnp.concatenate([b1, b1[rep]], axis=0)[:, None].astype(jnp.float32)

    # cheap 3x3 depthwise, BN folded, only the surviving [:keep] channels,
    # plus identity (center-tap) rows for the primary channels.
    wc = p['cheap_w'][:, 0].reshape(p['cheap_w'].shape[0], -1)            # (new, 9)
    wc = (wc * s2[:, None])[:keep].astype(jnp.float32)                    # (keep, 9)
    ident = jnp.zeros((init, ks * ks), jnp.float32).at[:, (ks * ks) // 2].set(1.0)
    wc_full = jnp.concatenate([ident, wc], axis=0)                        # (oup, 9)
    bc_full = jnp.concatenate([jnp.zeros((init,), jnp.float32),
                               b2[:keep].astype(jnp.float32)], axis=0)[:, None]
    return dict(oup=oup, w=w_comb, b=b_comb, wc=wc_full, bc=bc_full)


def _make_tap_masks(H, W, n_images, ks=3):
    """(ks*ks, n_images*H*W) 0/1 edge masks; also kill the circular wrap that
    pltpu.roll introduces at image boundaries when the batch is lane-folded."""
    HW = H * W
    L = n_images * HW
    p = jnp.arange(L)
    row = (p % HW) // W
    col = p % W
    r = ks // 2
    rows = []
    for di in range(-r, r + 1):
        for dj in range(-r, r + 1):
            m = jnp.ones((L,), jnp.bool_)
            if di > 0:
                m = m & (row < H - di)
            if di < 0:
                m = m & (row >= -di)
            if dj > 0:
                m = m & (col < W - dj)
            if dj < 0:
                m = m & (col >= -dj)
            rows.append(m)
    return jnp.stack(rows, axis=0).astype(jnp.float32)


def ghost_bottleneck_forward(x_nchw, params, *, grid_tiles=1):
    N, Cin, H, W = x_nchw.shape
    g1 = _prep_ghost_params(params['ghost1'])
    g2 = _prep_ghost_params(params['ghost2'])
    mid, oup = g1['oup'], g2['oup']
    assert Cin == oup, "identity shortcut requires input_channels == out_channels"
    assert N % grid_tiles == 0, "grid tiles must be image-aligned"
    HW = H * W
    L = N * HW
    Lb = L // grid_tiles
    assert Lb % 128 == 0, "lane block must be a multiple of 128"

    # NCHW -> lane-fold (C, N*H*W): layout plumbing outside the kernel.
    x2d = (x_nchw.astype(jnp.float32).reshape(N, Cin, HW)
           .transpose(1, 0, 2).reshape(Cin, L))
    masks = _make_tap_masks(H, W, N // grid_tiles)            # (9, Lb), per-block

    kernel = functools.partial(_ghost_bottleneck_kernel, W=W, ks=3)
    weights = (g1['w'], g1['b'], g1['wc'], g1['bc'],
               g2['w'], g2['b'], g2['wc'], g2['bc'])

    def full_spec(a):
        nd = a.ndim
        return pl.BlockSpec(a.shape, lambda i, _nd=nd: (0,) * _nd)

    flops = int(2 * L * (mid * Cin + oup * mid) + 3 * 9 * L * (mid + oup))
    bytes_accessed = int(4 * (x2d.size + oup * L + masks.size
                              + sum(int(w.size) for w in weights)))

    out = pl.pallas_call(
        kernel,
        out_shape=jax.ShapeDtypeStruct((oup, L), jnp.float32),
        grid=(grid_tiles,),
        in_specs=[pl.BlockSpec((Cin, Lb), lambda i: (0, i)),
                  full_spec(masks)]
                + [full_spec(w) for w in weights],
        out_specs=pl.BlockSpec((oup, Lb), lambda i: (0, i)),
        compiler_params=pltpu.CompilerParams(
            dimension_semantics=("parallel",)),
        cost_estimate=pl.CostEstimate(flops=flops, transcendentals=0,
                                      bytes_accessed=bytes_accessed),
    )(x2d, masks, *weights)

    return (out.reshape(oup, N, HW).transpose(1, 0, 2).reshape(N, oup, H, W))


# -------------------------- deterministic params --------------------------

def init_ghost_module_params(key, inp, oup, ratio=7, dw_size=3):
    init_ch = math.ceil(oup / ratio)
    new_ch = init_ch * (ratio - 1)
    k = jax.random.split(key, 10)
    return {
        'init_channels': init_ch, 'ratio': ratio, 'oup': oup,
        # torch layouts: primary_w (init, inp, 1, 1); cheap_w (new, 1, k, k)
        'primary_w': 0.2 * jax.random.normal(k[0], (init_ch, inp, 1, 1), jnp.float32),
        'bn1': (jax.random.uniform(k[1], (init_ch,), minval=0.5, maxval=1.5),
                0.1 * jax.random.normal(k[2], (init_ch,)),
                0.1 * jax.random.normal(k[3], (init_ch,)),
                jax.random.uniform(k[4], (init_ch,), minval=0.5, maxval=1.5)),
        'cheap_w': 0.2 * jax.random.normal(k[5], (new_ch, 1, dw_size, dw_size), jnp.float32),
        'bn2': (jax.random.uniform(k[6], (new_ch,), minval=0.5, maxval=1.5),
                0.1 * jax.random.normal(k[7], (new_ch,)),
                0.1 * jax.random.normal(k[8], (new_ch,)),
                jax.random.uniform(k[9], (new_ch,), minval=0.5, maxval=1.5)),
    }


# --------------------------- pure-JAX reference ---------------------------

def _ref_ghost_module(x_nhwc, p, relu):
    init_ch, oup = p['init_channels'], p['oup']
    w_pw = jnp.transpose(p['primary_w'], (2, 3, 1, 0))               # HWIO
    x1 = lax.conv_general_dilated(x_nhwc, w_pw, (1, 1), 'SAME',
                                  dimension_numbers=('NHWC', 'HWIO', 'NHWC'),
                                  precision=lax.Precision.HIGHEST)
    g, b, m, v = p['bn1']
    x1 = (x1 - m) / jnp.sqrt(v + _EPS) * g + b
    if relu:
        x1 = jnp.maximum(x1, 0.0)
    w_dw = jnp.transpose(p['cheap_w'], (2, 3, 1, 0))                 # HWIO, I=1
    x2 = lax.conv_general_dilated(x1, w_dw, (1, 1), 'SAME',
                                  dimension_numbers=('NHWC', 'HWIO', 'NHWC'),
                                  feature_group_count=init_ch,
                                  precision=lax.Precision.HIGHEST)
    g, b, m, v = p['bn2']
    x2 = (x2 - m) / jnp.sqrt(v + _EPS) * g + b
    if relu:
        x2 = jnp.maximum(x2, 0.0)
    return jnp.concatenate([x1, x2], axis=-1)[..., :oup]


def _ref_bottleneck(x_nchw, params):
    x = jnp.transpose(x_nchw, (0, 2, 3, 1))
    r = x
    x = _ref_ghost_module(x, params['ghost1'], True)
    x = _ref_ghost_module(x, params['ghost2'], False)
    return jnp.transpose(x + r, (0, 3, 1, 2))


# ------------------------------------ main ------------------------------------

if __name__ == "__main__":
    key = jax.random.PRNGKey(0)
    k_in, k1, k2 = jax.random.split(key, 3)

    N, Hh, Ww = 2, 16, 16
    input_channels, mid_channels, out_channels = 8, 14, 8   # identity shortcut

    x = jax.random.normal(k_in, (N, input_channels, Hh, Ww), jnp.float32)
    params = {
        'ghost1': init_ghost_module_params(k1, input_channels, mid_channels),
        'ghost2': init_ghost_module_params(k2, mid_channels, out_channels),
    }

    out = jax.block_until_ready(ghost_bottleneck_forward(x, params))
    assert out.shape == (N, out_channels, Hh, Ww)

    ref = jax.block_until_ready(_ref_bottleneck(x, params))
    max_err = float(jnp.max(jnp.abs(out - ref)))
    # 5e-3 tolerance covers MXU bf16-pass rounding of the chained f32 matmuls.
    assert max_err < 5e-3, f"Pallas vs reference mismatch: {max_err}"

    print("KERNEL_OK")
</pallas_src>

<mosaic_0001>
module attributes {stable_mosaic.version = 11 : i64} {
  func.func @_ghost_bottleneck_kernel(%arg0: i32, %arg1: memref<8x512xf32, #tpu.memory_space<vmem>>, %arg2: memref<9x512xf32, #tpu.memory_space<vmem>>, %arg3: memref<14x8xf32, #tpu.memory_space<vmem>>, %arg4: memref<14x1xf32, #tpu.memory_space<vmem>>, %arg5: memref<14x9xf32, #tpu.memory_space<vmem>>, %arg6: memref<14x1xf32, #tpu.memory_space<vmem>>, %arg7: memref<8x14xf32, #tpu.memory_space<vmem>>, %arg8: memref<8x1xf32, #tpu.memory_space<vmem>>, %arg9: memref<8x9xf32, #tpu.memory_space<vmem>>, %arg10: memref<8x1xf32, #tpu.memory_space<vmem>>, %arg11: memref<8x512xf32, #tpu.memory_space<vmem>>) attributes {dimension_semantics = [#tpu.dimension_semantics<parallel>], iteration_bounds = array<i64: 1>, scalar_prefetch = 0 : i64, scratch_operands = 0 : i64, tpu.core_type = #tpu.core_type<tc>, window_params = [{transform_indices = @transform_0, window_bounds = array<i64: 8, 512>}, {pipeline_mode = #tpu.pipeline_mode<synchronous>, transform_indices = @transform_1, window_bounds = array<i64: 9, 512>}, {pipeline_mode = #tpu.pipeline_mode<synchronous>, transform_indices = @transform_2, window_bounds = array<i64: 14, 8>}, {pipeline_mode = #tpu.pipeline_mode<synchronous>, transform_indices = @transform_3, window_bounds = array<i64: 14, 1>}, {pipeline_mode = #tpu.pipeline_mode<synchronous>, transform_indices = @transform_4, window_bounds = array<i64: 14, 9>}, {pipeline_mode = #tpu.pipeline_mode<synchronous>, transform_indices = @transform_5, window_bounds = array<i64: 14, 1>}, {pipeline_mode = #tpu.pipeline_mode<synchronous>, transform_indices = @transform_6, window_bounds = array<i64: 8, 14>}, {pipeline_mode = #tpu.pipeline_mode<synchronous>, transform_indices = @transform_7, window_bounds = array<i64: 8, 1>}, {pipeline_mode = #tpu.pipeline_mode<synchronous>, transform_indices = @transform_8, window_bounds = array<i64: 8, 9>}, {pipeline_mode = #tpu.pipeline_mode<synchronous>, transform_indices = @transform_9, window_bounds = array<i64: 8, 1>}, {transform_indices = @transform_10, window_bounds = array<i64: 8, 512>}]} {
    %c0 = arith.constant 0 : index
    %c0_0 = arith.constant 0 : index
    %0 = vector.load %arg1[%c0, %c0_0] : memref<8x512xf32, #tpu.memory_space<vmem>>, vector<8x512xf32>
    %c0_1 = arith.constant 0 : index
    %c0_2 = arith.constant 0 : index
    %1 = vector.load %arg2[%c0_1, %c0_2] : memref<9x512xf32, #tpu.memory_space<vmem>>, vector<9x512xf32>
    %c0_3 = arith.constant 0 : index
    %c0_4 = arith.constant 0 : index
    %2 = vector.load %arg3[%c0_3, %c0_4] : memref<14x8xf32, #tpu.memory_space<vmem>>, vector<14x8xf32>
    %c0_5 = arith.constant 0 : index
    %c0_6 = arith.constant 0 : index
    %3 = vector.load %arg4[%c0_5, %c0_6] : memref<14x1xf32, #tpu.memory_space<vmem>>, vector<14x1xf32>
    %c0_7 = arith.constant 0 : index
    %c0_8 = arith.constant 0 : index
    %4 = vector.load %arg5[%c0_7, %c0_8] : memref<14x9xf32, #tpu.memory_space<vmem>>, vector<14x9xf32>
    %c0_9 = arith.constant 0 : index
    %c0_10 = arith.constant 0 : index
    %5 = vector.load %arg6[%c0_9, %c0_10] : memref<14x1xf32, #tpu.memory_space<vmem>>, vector<14x1xf32>
    %cst = arith.constant dense<0.000000e+00> : vector<14x512xf32>
    %6 = tpu.matmul %2, %0, %cst {dimension_numbers = #tpu.dot_dimension_numbers<[1], [0], [0], [1], [0, 0, 1, 1], [], []>, precision = #tpu.contract_precision<fp32>} : vector<14x8xf32>, vector<8x512xf32>, vector<14x512xf32> -> vector<14x512xf32>
    %7 = vector.broadcast %3 : vector<14x1xf32> to vector<14x512xf32>
    %8 = arith.addf %6, %7 : vector<14x512xf32>
    %cst_11 = arith.constant 0.000000e+00 : f32
    %9 = vector.broadcast %cst_11 : f32 to vector<14x512xf32>
    %10 = arith.maximumf %8, %9 : vector<14x512xf32>
    %cst_12 = arith.constant 0.000000e+00 : f32
    %11 = vector.broadcast %cst_12 : f32 to vector<14x512xf32>
    %c17_i32 = arith.constant 17 : i32
    %12 = tpu.dynamic_rotate %10 by %c17_i32 dim 1 : vector<14x512xf32>, i32 -> vector<14x512xf32>
    %13 = vector.extract_strided_slice %1 {offsets = [0, 0], sizes = [1, 512], strides = [1, 1]} : vector<9x512xf32> to vector<1x512xf32>
    %14 = vector.broadcast %13 : vector<1x512xf32> to vector<14x512xf32>
    %15 = arith.mulf %12, %14 : vector<14x512xf32>
    %16 = vector.extract_strided_slice %4 {offsets = [0, 0], sizes = [14, 1], strides = [1, 1]} : vector<14x9xf32> to vector<14x1xf32>
    %17 = vector.broadcast %16 : vector<14x1xf32> to vector<14x512xf32>
    %18 = arith.mulf %17, %15 : vector<14x512xf32>
    %19 = arith.addf %11, %18 : vector<14x512xf32>
    %c16_i32 = arith.constant 16 : i32
    %20 = tpu.dynamic_rotate %10 by %c16_i32 dim 1 : vector<14x512xf32>, i32 -> vector<14x512xf32>
    %21 = vector.extract_strided_slice %1 {offsets = [1, 0], sizes = [1, 512], strides = [1, 1]} : vector<9x512xf32> to vector<1x512xf32>
    %22 = vector.broadcast %21 : vector<1x512xf32> to vector<14x512xf32>
    %23 = arith.mulf %20, %22 : vector<14x512xf32>
    %24 = vector.extract_strided_slice %4 {offsets = [0, 1], sizes = [14, 1], strides = [1, 1]} : vector<14x9xf32> to vector<14x1xf32>
    %25 = vector.broadcast %24 : vector<14x1xf32> to vector<14x512xf32>
    %26 = arith.mulf %25, %23 : vector<14x512xf32>
    %27 = arith.addf %19, %26 : vector<14x512xf32>
    %c15_i32 = arith.constant 15 : i32
    %28 = tpu.dynamic_rotate %10 by %c15_i32 dim 1 : vector<14x512xf32>, i32 -> vector<14x512xf32>
    %29 = vector.extract_strided_slice %1 {offsets = [2, 0], sizes = [1, 512], strides = [1, 1]} : vector<9x512xf32> to vector<1x512xf32>
    %30 = vector.broadcast %29 : vector<1x512xf32> to vector<14x512xf32>
    %31 = arith.mulf %28, %30 : vector<14x512xf32>
    %32 = vector.extract_strided_slice %4 {offsets = [0, 2], sizes = [14, 1], strides = [1, 1]} : vector<14x9xf32> to vector<14x1xf32>
    %33 = vector.broadcast %32 : vector<14x1xf32> to vector<14x512xf32>
    %34 = arith.mulf %33, %31 : vector<14x512xf32>
    %35 = arith.addf %27, %34 : vector<14x512xf32>
    %c1_i32 = arith.constant 1 : i32
    %36 = tpu.dynamic_rotate %10 by %c1_i32 dim 1 : vector<14x512xf32>, i32 -> vector<14x512xf32>
    %37 = vector.extract_strided_slice %1 {offsets = [3, 0], sizes = [1, 512], strides = [1, 1]} : vector<9x512xf32> to vector<1x512xf32>
    %38 = vector.broadcast %37 : vector<1x512xf32> to vector<14x512xf32>
    %39 = arith.mulf %36, %38 : vector<14x512xf32>
    %40 = vector.extract_strided_slice %4 {offsets = [0, 3], sizes = [14, 1], strides = [1, 1]} : vector<14x9xf32> to vector<14x1xf32>
    %41 = vector.broadcast %40 : vector<14x1xf32> to vector<14x512xf32>
    %42 = arith.mulf %41, %39 : vector<14x512xf32>
    %43 = arith.addf %35, %42 : vector<14x512xf32>
    %44 = vector.extract_strided_slice %4 {offsets = [0, 4], sizes = [14, 1], strides = [1, 1]} : vector<14x9xf32> to vector<14x1xf32>
    %45 = vector.broadcast %44 : vector<14x1xf32> to vector<14x512xf32>
    %46 = arith.mulf %45, %10 : vector<14x512xf32>
    %47 = arith.addf %43, %46 : vector<14x512xf32>
    %c511_i32 = arith.constant 511 : i32
    %48 = tpu.dynamic_rotate %10 by %c511_i32 dim 1 : vector<14x512xf32>, i32 -> vector<14x512xf32>
    %49 = vector.extract_strided_slice %1 {offsets = [5, 0], sizes = [1, 512], strides = [1, 1]} : vector<9x512xf32> to vector<1x512xf32>
    %50 = vector.broadcast %49 : vector<1x512xf32> to vector<14x512xf32>
    %51 = arith.mulf %48, %50 : vector<14x512xf32>
    %52 = vector.extract_strided_slice %4 {offsets = [0, 5], sizes = [14, 1], strides = [1, 1]} : vector<14x9xf32> to vector<14x1xf32>
    %53 = vector.broadcast %52 : vector<14x1xf32> to vector<14x512xf32>
    %54 = arith.mulf %53, %51 : vector<14x512xf32>
    %55 = arith.addf %47, %54 : vector<14x512xf32>
    %c497_i32 = arith.constant 497 : i32
    %56 = tpu.dynamic_rotate %10 by %c497_i32 dim 1 : vector<14x512xf32>, i32 -> vector<14x512xf32>
    %57 = vector.extract_strided_slice %1 {offsets = [6, 0], sizes = [1, 512], strides = [1, 1]} : vector<9x512xf32> to vector<1x512xf32>
    %58 = vector.broadcast %57 : vector<1x512xf32> to vector<14x512xf32>
    %59 = arith.mulf %56, %58 : vector<14x512xf32>
    %60 = vector.extract_strided_slice %4 {offsets = [0, 6], sizes = [14, 1], strides = [1, 1]} : vector<14x9xf32> to vector<14x1xf32>
    %61 = vector.broadcast %60 : vector<14x1xf32> to vector<14x512xf32>
    %62 = arith.mulf %61, %59 : vector<14x512xf32>
    %63 = arith.addf %55, %62 : vector<14x512xf32>
    %c496_i32 = arith.constant 496 : i32
    %64 = tpu.dynamic_rotate %10 by %c496_i32 dim 1 : vector<14x512xf32>, i32 -> vector<14x512xf32>
    %65 = vector.extract_strided_slice %1 {offsets = [7, 0], sizes = [1, 512], strides = [1, 1]} : vector<9x512xf32> to vector<1x512xf32>
    %66 = vector.broadcast %65 : vector<1x512xf32> to vector<14x512xf32>
    %67 = arith.mulf %64, %66 : vector<14x512xf32>
    %68 = vector.extract_strided_slice %4 {offsets = [0, 7], sizes = [14, 1], strides = [1, 1]} : vector<14x9xf32> to vector<14x1xf32>
    %69 = vector.broadcast %68 : vector<14x1xf32> to vector<14x512xf32>
    %70 = arith.mulf %69, %67 : vector<14x512xf32>
    %71 = arith.addf %63, %70 : vector<14x512xf32>
    %c495_i32 = arith.constant 495 : i32
    %72 = tpu.dynamic_rotate %10 by %c495_i32 dim 1 : vector<14x512xf32>, i32 -> vector<14x512xf32>
    %73 = vector.extract_strided_slice %1 {offsets = [8, 0], sizes = [1, 512], strides = [1, 1]} : vector<9x512xf32> to vector<1x512xf32>
    %74 = vector.broadcast %73 : vector<1x512xf32> to vector<14x512xf32>
    %75 = arith.mulf %72, %74 : vector<14x512xf32>
    %76 = vector.extract_strided_slice %4 {offsets = [0, 8], sizes = [14, 1], strides = [1, 1]} : vector<14x9xf32> to vector<14x1xf32>
    %77 = vector.broadcast %76 : vector<14x1xf32> to vector<14x512xf32>
    %78 = arith.mulf %77, %75 : vector<14x512xf32>
    %79 = arith.addf %71, %78 : vector<14x512xf32>
    %80 = vector.broadcast %5 : vector<14x1xf32> to vector<14x512xf32>
    %81 = arith.addf %79, %80 : vector<14x512xf32>
    %cst_13 = arith.constant 0.000000e+00 : f32
    %82 = vector.broadcast %cst_13 : f32 to vector<14x512xf32>
    %83 = arith.maximumf %81, %82 : vector<14x512xf32>
    %c0_14 = arith.constant 0 : index
    %c0_15 = arith.constant 0 : index
    %84 = vector.load %arg7[%c0_14, %c0_15] : memref<8x14xf32, #tpu.memory_space<vmem>>, vector<8x14xf32>
    %c0_16 = arith.constant 0 : index
    %c0_17 = arith.constant 0 : index
    %85 = vector.load %arg8[%c0_16, %c0_17] : memref<8x1xf32, #tpu.memory_space<vmem>>, vector<8x1xf32>
    %c0_18 = arith.constant 0 : index
    %c0_19 = arith.constant 0 : index
    %86 = vector.load %arg9[%c0_18, %c0_19] : memref<8x9xf32, #tpu.memory_space<vmem>>, vector<8x9xf32>
    %c0_20 = arith.constant 0 : index
    %c0_21 = arith.constant 0 : index
    %87 = vector.load %arg10[%c0_20, %c0_21] : memref<8x1xf32, #tpu.memory_space<vmem>>, vector<8x1xf32>
    %cst_22 = arith.constant dense<0.000000e+00> : vector<8x512xf32>
    %88 = tpu.matmul %84, %83, %cst_22 {dimension_numbers = #tpu.dot_dimension_numbers<[1], [0], [0], [1], [0, 0, 1, 1], [], []>, precision = #tpu.contract_precision<fp32>} : vector<8x14xf32>, vector<14x512xf32>, vector<8x512xf32> -> vector<8x512xf32>
    %89 = vector.broadcast %85 : vector<8x1xf32> to vector<8x512xf32>
    %90 = arith.addf %88, %89 : vector<8x512xf32>
    %cst_23 = arith.constant 0.000000e+00 : f32
    %91 = vector.broadcast %cst_23 : f32 to vector<8x512xf32>
    %c17_i32_24 = arith.constant 17 : i32
    %92 = tpu.dynamic_rotate %90 by %c17_i32_24 dim 1 : vector<8x512xf32>, i32 -> vector<8x512xf32>
    %93 = vector.extract_strided_slice %1 {offsets = [0, 0], sizes = [1, 512], strides = [1, 1]} : vector<9x512xf32> to vector<1x512xf32>
    %94 = vector.broadcast %93 : vector<1x512xf32> to vector<8x512xf32>
    %95 = arith.mulf %92, %94 : vector<8x512xf32>
    %96 = vector.extract_strided_slice %86 {offsets = [0, 0], sizes = [8, 1], strides = [1, 1]} : vector<8x9xf32> to vector<8x1xf32>
    %97 = vector.broadcast %96 : vector<8x1xf32> to vector<8x512xf32>
    %98 = arith.mulf %97, %95 : vector<8x512xf32>
    %99 = arith.addf %91, %98 : vector<8x512xf32>
    %c16_i32_25 = arith.constant 16 : i32
    %100 = tpu.dynamic_rotate %90 by %c16_i32_25 dim 1 : vector<8x512xf32>, i32 -> vector<8x512xf32>
    %101 = vector.extract_strided_slice %1 {offsets = [1, 0], sizes = [1, 512], strides = [1, 1]} : vector<9x512xf32> to vector<1x512xf32>
    %102 = vector.broadcast %101 : vector<1x512xf32> to vector<8x512xf32>
    %103 = arith.mulf %100, %102 : vector<8x512xf32>
    %104 = vector.extract_strided_slice %86 {offsets = [0, 1], sizes = [8, 1], strides = [1, 1]} : vector<8x9xf32> to vector<8x1xf32>
    %105 = vector.broadcast %104 : vector<8x1xf32> to vector<8x512xf32>
    %106 = arith.mulf %105, %103 : vector<8x512xf32>
    %107 = arith.addf %99, %106 : vector<8x512xf32>
    %c15_i32_26 = arith.constant 15 : i32
    %108 = tpu.dynamic_rotate %90 by %c15_i32_26 dim 1 : vector<8x512xf32>, i32 -> vector<8x512xf32>
    %109 = vector.extract_strided_slice %1 {offsets = [2, 0], sizes = [1, 512], strides = [1, 1]} : vector<9x512xf32> to vector<1x512xf32>
    %110 = vector.broadcast %109 : vector<1x512xf32> to vector<8x512xf32>
    %111 = arith.mulf %108, %110 : vector<8x512xf32>
    %112 = vector.extract_strided_slice %86 {offsets = [0, 2], sizes = [8, 1], strides = [1, 1]} : vector<8x9xf32> to vector<8x1xf32>
    %113 = vector.broadcast %112 : vector<8x1xf32> to vector<8x512xf32>
    %114 = arith.mulf %113, %111 : vector<8x512xf32>
    %115 = arith.addf %107, %114 : vector<8x512xf32>
    %c1_i32_27 = arith.constant 1 : i32
    %116 = tpu.dynamic_rotate %90 by %c1_i32_27 dim 1 : vector<8x512xf32>, i32 -> vector<8x512xf32>
    %117 = vector.extract_strided_slice %1 {offsets = [3, 0], sizes = [1, 512], strides = [1, 1]} : vector<9x512xf32> to vector<1x512xf32>
    %118 = vector.broadcast %117 : vector<1x512xf32> to vector<8x512xf32>
    %119 = arith.mulf %116, %118 : vector<8x512xf32>
    %120 = vector.extract_strided_slice %86 {offsets = [0, 3], sizes = [8, 1], strides = [1, 1]} : vector<8x9xf32> to vector<8x1xf32>
    %121 = vector.broadcast %120 : vector<8x1xf32> to vector<8x512xf32>
    %122 = arith.mulf %121, %119 : vector<8x512xf32>
    %123 = arith.addf %115, %122 : vector<8x512xf32>
    %124 = vector.extract_strided_slice %86 {offsets = [0, 4], sizes = [8, 1], strides = [1, 1]} : vector<8x9xf32> to vector<8x1xf32>
    %125 = vector.broadcast %124 : vector<8x1xf32> to vector<8x512xf32>
    %126 = arith.mulf %125, %90 : vector<8x512xf32>
    %127 = arith.addf %123, %126 : vector<8x512xf32>
    %c511_i32_28 = arith.constant 511 : i32
    %128 = tpu.dynamic_rotate %90 by %c511_i32_28 dim 1 : vector<8x512xf32>, i32 -> vector<8x512xf32>
    %129 = vector.extract_strided_slice %1 {offsets = [5, 0], sizes = [1, 512], strides = [1, 1]} : vector<9x512xf32> to vector<1x512xf32>
    %130 = vector.broadcast %129 : vector<1x512xf32> to vector<8x512xf32>
    %131 = arith.mulf %128, %130 : vector<8x512xf32>
    %132 = vector.extract_strided_slice %86 {offsets = [0, 5], sizes = [8, 1], strides = [1, 1]} : vector<8x9xf32> to vector<8x1xf32>
    %133 = vector.broadcast %132 : vector<8x1xf32> to vector<8x512xf32>
    %134 = arith.mulf %133, %131 : vector<8x512xf32>
    %135 = arith.addf %127, %134 : vector<8x512xf32>
    %c497_i32_29 = arith.constant 497 : i32
    %136 = tpu.dynamic_rotate %90 by %c497_i32_29 dim 1 : vector<8x512xf32>, i32 -> vector<8x512xf32>
    %137 = vector.extract_strided_slice %1 {offsets = [6, 0], sizes = [1, 512], strides = [1, 1]} : vector<9x512xf32> to vector<1x512xf32>
    %138 = vector.broadcast %137 : vector<1x512xf32> to vector<8x512xf32>
    %139 = arith.mulf %136, %138 : vector<8x512xf32>
    %140 = vector.extract_strided_slice %86 {offsets = [0, 6], sizes = [8, 1], strides = [1, 1]} : vector<8x9xf32> to vector<8x1xf32>
    %141 = vector.broadcast %140 : vector<8x1xf32> to vector<8x512xf32>
    %142 = arith.mulf %141, %139 : vector<8x512xf32>
    %143 = arith.addf %135, %142 : vector<8x512xf32>
    %c496_i32_30 = arith.constant 496 : i32
    %144 = tpu.dynamic_rotate %90 by %c496_i32_30 dim 1 : vector<8x512xf32>, i32 -> vector<8x512xf32>
    %145 = vector.extract_strided_slice %1 {offsets = [7, 0], sizes = [1, 512], strides = [1, 1]} : vector<9x512xf32> to vector<1x512xf32>
    %146 = vector.broadcast %145 : vector<1x512xf32> to vector<8x512xf32>
    %147 = arith.mulf %144, %146 : vector<8x512xf32>
    %148 = vector.extract_strided_slice %86 {offsets = [0, 7], sizes = [8, 1], strides = [1, 1]} : vector<8x9xf32> to vector<8x1xf32>
    %149 = vector.broadcast %148 : vector<8x1xf32> to vector<8x512xf32>
    %150 = arith.mulf %149, %147 : vector<8x512xf32>
    %151 = arith.addf %143, %150 : vector<8x512xf32>
    %c495_i32_31 = arith.constant 495 : i32
    %152 = tpu.dynamic_rotate %90 by %c495_i32_31 dim 1 : vector<8x512xf32>, i32 -> vector<8x512xf32>
    %153 = vector.extract_strided_slice %1 {offsets = [8, 0], sizes = [1, 512], strides = [1, 1]} : vector<9x512xf32> to vector<1x512xf32>
    %154 = vector.broadcast %153 : vector<1x512xf32> to vector<8x512xf32>
    %155 = arith.mulf %152, %154 : vector<8x512xf32>
    %156 = vector.extract_strided_slice %86 {offsets = [0, 8], sizes = [8, 1], strides = [1, 1]} : vector<8x9xf32> to vector<8x1xf32>
    %157 = vector.broadcast %156 : vector<8x1xf32> to vector<8x512xf32>
    %158 = arith.mulf %157, %155 : vector<8x512xf32>
    %159 = arith.addf %151, %158 : vector<8x512xf32>
    %160 = vector.broadcast %87 : vector<8x1xf32> to vector<8x512xf32>
    %161 = arith.addf %159, %160 : vector<8x512xf32>
    %162 = arith.addf %161, %0 : vector<8x512xf32>
    %c0_32 = arith.constant 0 : index
    %c0_33 = arith.constant 0 : index
    %163 = vector.load %arg11[%c0_32, %c0_33] : memref<8x512xf32, #tpu.memory_space<vmem>>, vector<8x512xf32>
    tpu.vector_store %arg11[%c0_32, %c0_33], %162 {strides = array<i32>} : memref<8x512xf32, #tpu.memory_space<vmem>>, vector<8x512xf32>,
    return
  }
  func.func @transform_0(%arg0: i32) -> (i32, i32) {
    %c0_i32 = arith.constant 0 : i32
    %c0_i32_0 = arith.constant 0 : i32
    return %c0_i32, %arg0 : i32, i32
  }
  func.func @transform_1(%arg0: i32) -> (i32, i32) {
    %c0_i32 = arith.constant 0 : i32
    %c0_i32_0 = arith.constant 0 : i32
    %c0_i32_1 = arith.constant 0 : i32
    return %c0_i32, %c0_i32_0 : i32, i32
  }
  func.func @transform_2(%arg0: i32) -> (i32, i32) {
    %c0_i32 = arith.constant 0 : i32
    %c0_i32_0 = arith.constant 0 : i32
    %c0_i32_1 = arith.constant 0 : i32
    return %c0_i32, %c0_i32_0 : i32, i32
  }
  func.func @transform_3(%arg0: i32) -> (i32, i32) {
    %c0_i32 = arith.constant 0 : i32
    %c0_i32_0 = arith.constant 0 : i32
    %c0_i32_1 = arith.constant 0 : i32
    return %c0_i32, %c0_i32_0 : i32, i32
  }
  func.func @transform_4(%arg0: i32) -> (i32, i32) {
    %c0_i32 = arith.constant 0 : i32
    %c0_i32_0 = arith.constant 0 : i32
    %c0_i32_1 = arith.constant 0 : i32
    return %c0_i32, %c0_i32_0 : i32, i32
  }
  func.func @transform_5(%arg0: i32) -> (i32, i32) {
    %c0_i32 = arith.constant 0 : i32
    %c0_i32_0 = arith.constant 0 : i32
    %c0_i32_1 = arith.constant 0 : i32
    return %c0_i32, %c0_i32_0 : i32, i32
  }
  func.func @transform_6(%arg0: i32) -> (i32, i32) {
    %c0_i32 = arith.constant 0 : i32
    %c0_i32_0 = arith.constant 0 : i32
    %c0_i32_1 = arith.constant 0 : i32
    return %c0_i32, %c0_i32_0 : i32, i32
  }
  func.func @transform_7(%arg0: i32) -> (i32, i32) {
    %c0_i32 = arith.constant 0 : i32
    %c0_i32_0 = arith.constant 0 : i32
    %c0_i32_1 = arith.constant 0 : i32
    return %c0_i32, %c0_i32_0 : i32, i32
  }
  func.func @transform_8(%arg0: i32) -> (i32, i32) {
    %c0_i32 = arith.constant 0 : i32
    %c0_i32_0 = arith.constant 0 : i32
    %c0_i32_1 = arith.constant 0 : i32
    return %c0_i32, %c0_i32_0 : i32, i32
  }
  func.func @transform_9(%arg0: i32) -> (i32, i32) {
    %c0_i32 = arith.constant 0 : i32
    %c0_i32_0 = arith.constant 0 : i32
    %c0_i32_1 = arith.constant 0 : i32
    return %c0_i32, %c0_i32_0 : i32, i32
  }
  func.func @transform_10(%arg0: i32) -> (i32, i32) {
    %c0_i32 = arith.constant 0 : i32
    %c0_i32_0 = arith.constant 0 : i32
    return %c0_i32, %arg0 : i32, i32
  }
}

</mosaic_0001>

<bundles_post_ra>
// kernel: tpu_custom_call.1
= control target key start
LH: loop header
LB: loop body
LE: loop exit
PB: predicated region body
PF: predicated region fallthrough
CT: control target
= control target key end

     0   :  { %15 = vsyncpa [#allocation3], 0  ;;  %s4637_s0 = inlined_call_operand.hbm [shape: f32[8,512], index: 0, kind: input, shape index: {}]   ;;  %s4638_s1 = inlined_call_operand.vmem [shape: f32[9,512], index: 1, kind: input, shape index: {}]   ;;  %s4639_s2 = inlined_call_operand.vmem [shape: f32[14,8], index: 2, kind: input, shape index: {}]   ;;  %s4640_s3 = inlined_call_operand.vmem [shape: f32[14,1], index: 3, kind: input, shape index: {}]   ;;  %s4641_s4 = inlined_call_operand.vmem [shape: f32[14,9], index: 4, kind: input, shape index: {}]   ;;  %s4642_s5 = inlined_call_operand.vmem [shape: f32[14,1], index: 5, kind: input, shape index: {}]   ;;  %s4643_s6 = inlined_call_operand.vmem [shape: f32[8,14], index: 6, kind: input, shape index: {}]   ;;  %s4644_s7 = inlined_call_operand.vmem [shape: f32[8,1], index: 7, kind: input, shape index: {}]   ;;  %s4645_s8 = inlined_call_operand.vmem [shape: f32[8,9], index: 8, kind: input, shape index: {}]   ;;  %s4646_s9 = inlined_call_operand.vmem [shape: f32[8,1], index: 9, kind: input, shape index: {}]   ;;  %s4647_s10 = inlined_call_operand.hbm [shape: f32[8,512], index: 10, kind: output, shape index: {}]  }
   0x1   :  { %16 = vsyncpa [#allocation4], 0  ;;  %s3257_s13 = smov [#allocation2]   ;;  %s3209_s17 = scalar_lea.hbm %s4637_s0, 512 }
   0x2   :  { %s23_s14 = sshll.u32 %s3257_s13, 4  ;;  %p3210_p0 = scmp.ne.s32.totalorder %s4637_s0, %s3209_s17  ;;  %s24_s14 = int_to_ptr.vmem [resolvable:$true] %s23_s14 }
   0x3   :  { %p3213_p1 = scmp.lt.u32.totalorder %s3209_s17, %s4637_s0 }
   0x5   :  { %p3215_p2 = pnand %p3213_p1, %p3210_p0 }
   0x7   :  { %3218 = shalt.err (!%p3215_p2)
}
   0x8   :  { %s3219_s22 = scalar_lea.vmem %s24_s14, 512  ;;  %p3224_p4 = scmp.lt.s32.totalorder %s24_s14, %s24_s14 }
   0x9   :  { %p3220_p3 = scmp.ne.s32.totalorder %s24_s14, %s3219_s22  ;;  %p3225_p5 = scmp.lt.s32.totalorder %s3219_s22, %s3219_s22 }
   0xb   :  { %p3226_p6 = por %p3225_p5, %p3224_p4 }
   0xd   :  { %p3227_p7 = pnand %p3226_p6, %p3220_p3 }
   0xf   :  { %3230 = shalt.err (!%p3227_p7)
}
  0x10   :  { %26 = dma.hbm_to_vmem [thread:$0]  %s4637_s0, 512, %s24_s14, [#allocation3]  }
  0x11   :  { %3253 = dma.done.wait [#allocation3], 512  }
  0x12   :  { %3254 = vsyncadd [#allocation3], 4294966784  ;;  %v4648_v0 = vmov 0.0   ;;  %v3259_v1 = vmov 2   ;;  %v4650_v2 = vmov 0   ;;  %vm78_vm0 = vcmask 64512  }
  0x13   :  { %151 = vmatprep.mubr.f32.mxu0 %v4648_v0  ;;  %665 = vmatprep.mubr.f32.mxu1 %v4648_v0  ;;  %v49_v3 = vld [vmem:[#allocation2 + $0x8] sm:$0xff]  ;;  %v51_v4 = vld [vmem:[#allocation2 + $0x18] sm:$0xff]  ;;  %v48_v5 = vld [vmem:[#allocation2] sm:$0xff]  ;;  %v4657_v37 = vmov 3   ;;  %v4656_v38 = vmov 1   ;;  %v4655_v45 = vmov 4  }
  0x14   :  { %3182 = vset.pattern.permute.xlu0 %v3259_v1  ;;  %3180 = vset.pattern.permute.xlu1 %v4650_v2  ;;  %v3348_v6 = vand.u32 4294901760, %v49_v3  ;;  %v3350_v7 = vand.u32 4294901760, %v51_v4  ;;  %v3352_v8 = vand.u32 4294901760, %v48_v5  ;;  %v50_v9 = vld [vmem:[#allocation2 + $0x10] sm:$0xff]  ;;  %v60_v10 = vld [vmem:[%s4639_s2] sm:$0xff]  ;;  %v4653_v46 = vmov 5  }
  0x15   :  { %v3357_v11 = vand.u32 4294901760, %v50_v9  ;;  %v80_v12 = vsel %vm78_vm0, %v60_v10, 0  ;;  %v61_v13 = vld [vmem:[%s4639_s2 + $0x8] sm:$0x3f]  ;;  %v3410_v31 = vld [vmem:[%s4641_s4] sm:$0xff]  ;;  %v4652_v47 = vmov 7  }
  0x16   :  { %v3366_v14 = vld [vmem:[%s4641_s4 + $0x8] sm:$0x3f]  ;;  %86 = vmatprep.subr.mxu0 %v3348_v6  ;;  %600 = vmatprep.subr.mxu1 %v3350_v7  ;;  %v3371_v15 = vsub.f32 %v48_v5, %v3352_v8  ;;  %v3373_v16 = vand.u32 4294901760, %v80_v12  ;;  %v83_v17 = vsel %vm78_vm0, %v61_v13, 0  ;;  %v3377_v18 = vsub.f32 %v49_v3, %v3348_v6  ;;  %v62_v51 = vld [vmem:[%s4640_s3] sm:$0xff]  ;;  %s3269_s16 = smov 17  }
  0x17   :  { %88 = vmatpush1.msra.mxu0 %v3352_v8  ;;  %602 = vmatpush1.msra.mxu1 %v3357_v11  ;;  %v3382_v19 = vsub.f32 %v50_v9, %v3357_v11  ;;  %v3384_v20 = vand.u32 4294901760, %v83_v17  ;;  %v3387_v21 = vsub.f32 %v51_v4, %v3350_v7  ;;  %v4654_v48 = vmov 6   ;;  %v63_v50 = vld [vmem:[%s4640_s3 + $0x8] sm:$0x3f]  ;;  %s3268_s3 = smov 15   ;;  %s3270_s17 = smov 127  }
  0x18   :  { %v153_v22 = vsub.f32 %v80_v12, %v3373_v16  ;;  %v176_v23 = vand.u32 4294901760, %v3377_v18  ;;  %v182_v24 = vand.u32 4294901760, %v3371_v15  ;;  %1325 = vperm.xlu0 %3182, %v3366_v14   ;;  %1179 = vperm.xlu1 %3180, %v3366_v14   ;;  %v4651_v49 = vmov 8   ;;  %v67_v52 = vld [vmem:[%s4642_s5 + $0x8] sm:$0x3f]  ;;  %s3271_s18 = smov 111  }
  0x19   :  { %v3395_v25 = vsub.f32 %v83_v17, %v3384_v20  ;;  %v690_v26 = vand.u32 4294901760, %v3387_v21  ;;  %v696_v27 = vand.u32 4294901760, %v3382_v19  ;;  %s3272_s19 = smov 16   ;;  %s3273_s20 = smov 1   ;;  %vm1768_vm9 = vcmask 113664  }
  0x1a   :  { %v3399_v28 = vand.u32 4294901760, %v153_v22  ;;  %v177_v29 = vsub.f32 %v3377_v18, %v176_v23  ;;  %v183_v30 = vsub.f32 %v3371_v15, %v182_v24  ;;  %s3274_s21 = smov 113   ;;  %s3275_s22 = smov 112   ;;  %vm1772_vm10 = vcmask 1045504  }
  0x1b   :  { %v3413_v32 = vand.u32 4294901760, %v3395_v25  ;;  %v691_v33 = vsub.f32 %v3387_v21, %v690_v26  ;;  %v697_v34 = vsub.f32 %v3382_v19, %v696_v27 }
  0x1c   :  { %v155_v35 = vsub.f32 %v153_v22, %v3399_v28  ;;  %v178_v36 = vand.u32 4294901760, %v177_v29  ;;  %3185 = vset.pattern.permute.xlu0 %v4657_v37  ;;  %3181 = vset.pattern.permute.xlu1 %v4656_v38  ;;  %v184_v42 = vand.u32 4294901760, %v183_v30 }
  0x1d   :  { %v166_v39 = vsub.f32 %v3395_v25, %v3413_v32  ;;  %v692_v40 = vand.u32 4294901760, %v691_v33  ;;  %1394 = vperm.xlu0 %3185, %v3410_v31   ;;  %1252 = vperm.xlu1 %3181, %v3366_v14   ;;  %v698_v43 = vand.u32 4294901760, %v697_v34 }
  0x1e   :  { %v156_v41 = vand.u32 4294901760, %v155_v35  ;;  %179 = vmatprep.subr.mxu0 %v178_v36  ;;  %v66_v35 = vld [vmem:[%s4642_s5] sm:$0xff] }
  0x1f   :  { %693 = vmatprep.subr.mxu1 %v692_v40  ;;  %v167_v44 = vand.u32 4294901760, %v166_v39 }
  0x20   :  { %157 = vmatmul.mubr.f32.vlgmr.msra.gmra.mrb[0].mxu0 %v156_v41  ;;  %671 = vmatmul.mubr.f32.vlgmr.msra.gmra.mrb[0].mxu1 %v156_v41 }
  0x21   :  { %162 = vmatprep.mubr.f32.mxu0 %v4648_v0  ;;  %676 = vmatprep.mubr.f32.mxu1 %v4648_v0 }
  0x22   :  { %185 = vmatpush1.msra.mxu0 %v184_v42  ;;  %699 = vmatpush1.msra.mxu1 %v698_v43  ;;  %v1137_v42 = vlaneseq }
  0x23   :  { %265 = vmatprep.subr.mxu0 %v3377_v18  ;;  %779 = vmatprep.subr.mxu1 %v3387_v21 }
  0x24   :  { %168 = vmatmul.mubr.f32.gmra.mrb[2].mxu0 %v167_v44  ;;  %682 = vmatmul.mubr.f32.gmra.mrb[2].mxu1 %v167_v44 }
  0x25   :  { %248 = vmatprep.mubr.f32.mxu0 %v4648_v0  ;;  %762 = vmatprep.mubr.f32.mxu1 %v4648_v0 }
  0x26   :  { %3186 = vset.pattern.permute.xlu0 %v4655_v45  ;;  %1248 = vperm.xlu1 %3181, %v3410_v31  }
  0x27   :  { %1422 = vperm.xlu0 %3186, %v3366_v14  }
  0x28   :  { %250 = vmatmul.mubr.f32.vlgmr.msra.gmra.mrb[0].mxu0 %v3373_v16  ;;  %764 = vmatmul.mubr.f32.vlgmr.msra.gmra.mrb[0].mxu1 %v3373_v16 }
  0x29   :  { %255 = vmatprep.mubr.f32.mxu0 %v4648_v0  ;;  %769 = vmatprep.mubr.f32.mxu1 %v4648_v0 }
  0x2a   :  { %268 = vmatpush1.msra.mxu0 %v3371_v15  ;;  %782 = vmatpush1.msra.mxu1 %v3382_v19 }
  0x2b   :  { %349 = vmatprep.subr.mxu0 %v3348_v6  ;;  %863 = vmatprep.subr.mxu1 %v3350_v7 }
  0x2c   :  { %257 = vmatmul.mubr.f32.gmra.mrb[2].mxu0 %v3384_v20  ;;  %771 = vmatmul.mubr.f32.gmra.mrb[2].mxu1 %v3384_v20 }
  0x2d   :  { %331 = vmatprep.mubr.f32.mxu0 %v4648_v0  ;;  %845 = vmatprep.mubr.f32.mxu1 %v4648_v0 }
  0x2e   :  { %1418 = vperm.xlu0 %3186, %v3410_v31   ;;  %3183 = vset.pattern.permute.xlu1 %v3259_v1 }
  0x2f   :  { %1321 = vperm.xlu1 %3183, %v3410_v31  }
  0x30   :  { %334 = vmatmul.mubr.f32.vlgmr.msra.gmra.mrb[0].mxu0 %v153_v22  ;;  %848 = vmatmul.mubr.f32.vlgmr.msra.gmra.mrb[0].mxu1 %v153_v22 }
  0x31   :  { %339 = vmatprep.mubr.f32.mxu0 %v4648_v0  ;;  %853 = vmatprep.mubr.f32.mxu1 %v4648_v0 }
  0x32   :  { %351 = vmatpush1.msra.mxu0 %v3352_v8  ;;  %865 = vmatpush1.msra.mxu1 %v3357_v11 }
  0x33   :  { %436 = vmatprep.subr.mxu0 %v176_v23  ;;  %950 = vmatprep.subr.mxu1 %v690_v26 }
  0x34   :  { %342 = vmatmul.mubr.f32.gmra.mrb[2].mxu0 %v3395_v25  ;;  %856 = vmatmul.mubr.f32.gmra.mrb[2].mxu1 %v3395_v25 }
  0x35   :  { %414 = vmatprep.mubr.f32.mxu0 %v4648_v0  ;;  %928 = vmatprep.mubr.f32.mxu1 %v4648_v0 }
  0x36   :  { %3188 = vset.pattern.permute.xlu0 %v4653_v46  ;;  %3184 = vset.pattern.permute.xlu1 %v4657_v37 }
  0x37   :  { %1491 = vperm.xlu0 %3188, %v3410_v31   ;;  %1398 = vperm.xlu1 %3184, %v3366_v14  }
  0x38   :  { %418 = vmatmul.mubr.f32.vlgmr.msra.gmra.mrb[0].mxu0 %v3399_v28  ;;  %932 = vmatmul.mubr.f32.vlgmr.msra.gmra.mrb[0].mxu1 %v3399_v28 }
  0x39   :  { %423 = vmatprep.mubr.f32.mxu0 %v4648_v0  ;;  %937 = vmatprep.mubr.f32.mxu1 %v4648_v0 }
  0x3a   :  { %440 = vmatpush1.msra.mxu0 %v182_v24  ;;  %954 = vmatpush1.msra.mxu1 %v696_v27 }
  0x3b   :  { %519 = vmatprep.subr.mxu0 %v3348_v6  ;;  %1033 = vmatprep.subr.mxu1 %v3350_v7 }
  0x3c   :  { %427 = vmatmul.mubr.f32.gmra.mrb[2].mxu0 %v3413_v32  ;;  %941 = vmatmul.mubr.f32.gmra.mrb[2].mxu1 %v3413_v32 }
  0x3d   :  { %503 = vmatprep.mubr.f32.mxu0 %v4648_v0  ;;  %1017 = vmatprep.mubr.f32.mxu1 %v4648_v0 }
  0x3e   :  { %3190 = vset.pattern.permute.xlu0 %v4652_v47  ;;  %3187 = vset.pattern.permute.xlu1 %v4653_v46 }
  0x3f   :  { %1641 = vperm.xlu0 %3190, %v3366_v14   ;;  %1495 = vperm.xlu1 %3187, %v3366_v14  }
  0x40   :  { %505 = vmatmul.mubr.f32.vlgmr.msra.gmra.mrb[0].mxu0 %v3373_v16  ;;  %1019 = vmatmul.mubr.f32.vlgmr.msra.gmra.mrb[0].mxu1 %v3373_v16 }
  0x41   :  { %510 = vmatprep.mubr.f32.mxu0 %v4648_v0  ;;  %1024 = vmatprep.mubr.f32.mxu1 %v4648_v0 }
  0x42   :  { %521 = vmatpush1.msra.mxu0 %v3352_v8  ;;  %1035 = vmatpush1.msra.mxu1 %v3357_v11 }
  0x43   :  { %1637 = vperm.xlu0 %3190, %v3410_v31   ;;  %3189 = vset.pattern.permute.xlu1 %v4654_v48 }
  0x44   :  { %512 = vmatmul.mubr.f32.gmra.mrb[2].mxu0 %v3384_v20  ;;  %1026 = vmatmul.mubr.f32.gmra.mrb[2].mxu1 %v3384_v20 }
  0x45   :  { %584 = vmatprep.mubr.f32.mxu0 %v4648_v0  ;;  %1098 = vmatprep.mubr.f32.mxu1 %v4648_v0 }
  0x46   :  { %1568 = vperm.xlu1 %3189, %v3366_v14  }
  0x47   :  { %3192 = vset.pattern.permute.xlu0 %v4651_v49 }
  0x48   :  { %586 = vmatmul.mubr.f32.vlgmr.msra.gmra.mrb[0].mxu0 %v3373_v16  ;;  %1100 = vmatmul.mubr.f32.vlgmr.msra.gmra.mrb[0].mxu1 %v3373_v16 }
  0x49   :  { %591 = vmatprep.mubr.f32.mxu0 %v4648_v0  ;;  %1105 = vmatprep.mubr.f32.mxu1 %v4648_v0 }
  0x4a   :  { %1710 = vperm.xlu0 %3192, %v3410_v31   ;;  %1564 = vperm.xlu1 %3189, %v3410_v31  }
  0x4c   :  { %593 = vmatmul.mubr.f32.gmra.mrb[2].mxu0 %v3384_v20  ;;  %1107 = vmatmul.mubr.f32.gmra.mrb[2].mxu1 %v3384_v20 }
  0x4d   :  { %1853 = vmatprep.mubr.f32.mxu0 %v4648_v0  ;;  %2344 = vmatprep.mubr.f32.mxu1 %v4648_v0 }
  0x4e   :  { %3193 = vset.pattern.permute.xlu0 %v4650_v2  ;;  %3191 = vset.pattern.permute.xlu1 %v4651_v49 }
  0x4f   :  { %75 = vperm.xlu0 %3193, %v63_v50   ;;  %1714 = vperm.xlu1 %3191, %v3366_v14   ;;  %v3704_v50 = vshrl.u32 %v1137_v42, 7 }
  0x53   :  { %70 = vperm.xlu0 %3193, %v62_v51   ;;  %3194 = vset.pattern.permute.xlu1 %v4650_v2  ;;  %v1298_v2 = vsub.s32 2, %v3704_v50 }
  0x57   :  { %1174 = vperm.xlu0 %3193, %v3410_v31  }
  0x5b   :  { %1740 = vperm.xlu0 %3193, %v67_v52  }
  0x97   :  { %v3520_v53 = vpop.permute.xlu0 %1325  ;;  %v3620_v22 = vpop.permute.xlu1 %1179 }
  0x98   :  { %4703 = vst [vmem:[#allocation8_spill] sm:$0xff] %v3520_v53 }
  0x9c   :  { %v3522_v54 = vpop.permute.xlu0 %1394  ;;  %v3630_v26 = vpop.permute.xlu1 %1252 }
  0xa5   :  { %v3642_v28 = vpop.permute.xlu1 %1248 }
  0xa6   :  { %v3524_v55 = vpop.permute.xlu0 %1422 }
  0xad   :  { %v3526_v56 = vpop.permute.xlu0 %1418 }
  0xae   :  { %v3648_v29 = vpop.permute.xlu1 %1321 }
  0xb6   :  { %v3528_v57 = vpop.permute.xlu0 %1491  ;;  %v3654_v30 = vpop.permute.xlu1 %1398 }
  0xb7   :  { %4706 = vst [vmem:[#allocation11_spill] sm:$0xff] %v3654_v30 }
  0xbe   :  { %v3530_v58 = vpop.permute.xlu0 %1641  ;;  %v3664_v31 = vpop.permute.xlu1 %1495 }
  0xbf   :  { %4704 = vst [vmem:[#allocation9_spill] sm:$0xff] %v3530_v58  ;;  %4707 = vst [vmem:[#allocation12_spill] sm:$0xff] %v3664_v31 }
  0xc2   :  { %v3532_v59 = vpop.permute.xlu0 %1637 }
  0xc5   :  { %v3670_v32 = vpop.permute.xlu1 %1568 }
  0xc6   :  { %4708 = vst [vmem:[#allocation13_spill] sm:$0xff] %v3670_v32 }
  0xc9   :  { %v3534_v60 = vpop.permute.xlu0 %1710  ;;  %v3678_v34 = vpop.permute.xlu1 %1564 }
  0xca   :  { %4705 = vst [vmem:[#allocation10_spill] sm:$0xff] %v3534_v60 }
  0xce   :  { %v3536_v61 = vpop.permute.xlu0 %75  ;;  %v3689_v36 = vpop.permute.xlu1 %1714 }
  0xcf   :  { %4709 = vst [vmem:[#allocation14_spill] sm:$0xff] %v3689_v36 }
  0xd2   :  { %v71_v62 = vpop.permute.xlu0 %70 }
  0xd6   :  { %v3676_v33 = vpop.permute.xlu0 %1174 }
  0xda   :  { %v3691_v39 = vpop.permute.xlu0 %1740 }
  0xdb   :  { %4710 = vst [vmem:[#allocation15_spill] sm:$0xff] %v3691_v39 }
 0x11b   :  { %v587_v63 = vpop.f32.mrb[0].mxu0  ;;  %v1101_v3 = vpop.f32.mrb[0].mxu1 }
 0x11c   :  { %v3088_v4 = vadd.f32 %v587_v63, %v71_v62  ;;  %v589_v5 = vpop.f32.mrb[1].mxu0  ;;  %v1103_v6 = vpop.f32.mrb[1].mxu1  ;;  %v3092_v8 = vadd.f32 %v1101_v3, %v71_v62  ;;  %v3721_v63 = vld [vmem:[%s4638_s1 + $0x10] sm:$0xff] }
 0x11d   :  { %v3089_v14 = vadd.f32 %v589_v5, %v71_v62  ;;  %v3093_v16 = vadd.f32 %v1103_v6, %v71_v62  ;;  %v3716_v62 = vld [vmem:[%s4638_s1 + $0x8] sm:$0xff]  ;;  %v1225_v5 = vsub.s32 1, %v3704_v50 }
 0x11e   :  { %v3538_v7 = vmax.f32 %v3088_v4, 0.0  ;;  %v3544_v13 = vmax.f32 %v3092_v8, 0.0 }
 0x11f   :  { %v594_v9 = vpop.f32.mrb[2].mxu0  ;;  %v1108_v10 = vpop.f32.mrb[2].mxu1  ;;  %v3554_v15 = vmax.f32 %v3089_v14, 0.0  ;;  %v3560_v17 = vmax.f32 %v3093_v16, 0.0  ;;  %v3740_v14 = vld [vmem:[%s4638_s1] sm:$0xff]  ;;  %v3745_v16 = vld [vmem:[%s4638_s1 + $0x18] sm:$0xff] }
 0x120   :  { %v596_v11 = vpop.f32.mrb[3].mxu0  ;;  %v1110_v12 = vpop.f32.mrb[3].mxu1  ;;  %1271 = vrot.lane.b32.xlu1 %v3538_v7, %s3268_s3  ;;  %1121 = vrot.lane.b32.xlu0 %v3538_v7, %s3269_s16  ;;  %v3094_v18 = vadd.f32 %v1108_v10, %v3536_v61  ;;  %v3090_v19 = vadd.f32 %v594_v9, %v3536_v61  ;;  %v3780_v48 = vrot.slane %v3740_v14, %v1225_v5 }
 0x121   :  { %v3091_v23 = vadd.f32 %v596_v11, %v3536_v61  ;;  %v3095_v25 = vadd.f32 %v1110_v12, %v3536_v61  ;;  %v3708_v61 = vand.u32 127, %v1137_v42 }
 0x122   :  { %v3596_v20 = vmax.f32 %v3094_v18, 0.0  ;;  %v3602_v21 = vmax.f32 %v3090_v19, 0.0  ;;  %v3751_v18 = vrot.slane %v3716_v62, %v1225_v5  ;;  %v3754_v19 = vrot.slane %v3721_v63, %v1225_v5 }
 0x123   :  { %v3627_v24 = vmax.f32 %v3091_v23, 0.0  ;;  %v3636_v27 = vmax.f32 %v3095_v25, 0.0  ;;  %vm1139_vm1 = vcmp.lt.s32.totalorder %v3708_v61, 17  ;;  %vm1214_vm2 = vcmp.lt.s32.totalorder %v3708_v61, 16 }
 0x124   :  { %1441 = vrot.lane.b32.xlu1 %v3538_v7, %s3270_s17  ;;  %1129 = vrot.lane.b32.xlu0 %v3544_v13, %s3269_s16  ;;  %vm1287_vm3 = vcmp.lt.s32.totalorder %v3708_v61, 15  ;;  %vm1360_vm4 = vcmp.lt.s32.totalorder %v3708_v61, 1  ;;  %vm1457_vm5 = vcmp.lt.s32.totalorder %v3708_v61, 127  ;;  %vm1530_vm6 = vcmp.lt.s32.totalorder %v3708_v61, 113 }
 0x125   :  { %vm1603_vm7 = vcmp.lt.s32.totalorder %v3708_v61, 112  ;;  %vm1676_vm8 = vcmp.lt.s32.totalorder %v3708_v61, 111 }
 0x128   :  { %1660 = vrot.lane.b32.xlu1 %v3538_v7, %s3271_s18  ;;  %1198 = vrot.lane.b32.xlu0 %v3538_v7, %s3272_s19 }
 0x12c   :  { %1125 = vrot.lane.b32.xlu1 %v3554_v15, %s3269_s16  ;;  %1206 = vrot.lane.b32.xlu0 %v3544_v13, %s3272_s19 }
 0x130   :  { %1133 = vrot.lane.b32.xlu1 %v3560_v17, %s3269_s16  ;;  %1279 = vrot.lane.b32.xlu0 %v3544_v13, %s3268_s3 }
 0x134   :  { %1202 = vrot.lane.b32.xlu1 %v3554_v15, %s3272_s19  ;;  %1344 = vrot.lane.b32.xlu0 %v3538_v7, %s3273_s20 }
 0x138   :  { %1210 = vrot.lane.b32.xlu1 %v3560_v17, %s3272_s19  ;;  %1352 = vrot.lane.b32.xlu0 %v3544_v13, %s3273_s20 }
 0x13c   :  { %1275 = vrot.lane.b32.xlu1 %v3554_v15, %s3268_s3  ;;  %1449 = vrot.lane.b32.xlu0 %v3544_v13, %s3270_s17 }
 0x140   :  { %1283 = vrot.lane.b32.xlu1 %v3560_v17, %s3268_s3  ;;  %1514 = vrot.lane.b32.xlu0 %v3538_v7, %s3274_s21 }
 0x144   :  { %1348 = vrot.lane.b32.xlu1 %v3554_v15, %s3273_s20  ;;  %1522 = vrot.lane.b32.xlu0 %v3544_v13, %s3274_s21 }
 0x148   :  { %1356 = vrot.lane.b32.xlu1 %v3560_v17, %s3273_s20  ;;  %1587 = vrot.lane.b32.xlu0 %v3538_v7, %s3275_s22 }
 0x14c   :  { %1445 = vrot.lane.b32.xlu1 %v3554_v15, %s3270_s17  ;;  %1595 = vrot.lane.b32.xlu0 %v3544_v13, %s3275_s22 }
 0x150   :  { %1453 = vrot.lane.b32.xlu1 %v3560_v17, %s3270_s17  ;;  %1281 = vrot.lane.b32.xlu0 %v3596_v20, %s3268_s3 }
 0x154   :  { %1518 = vrot.lane.b32.xlu1 %v3554_v15, %s3274_s21  ;;  %1443 = vrot.lane.b32.xlu0 %v3602_v21, %s3270_s17 }
 0x158   :  { %1526 = vrot.lane.b32.xlu1 %v3560_v17, %s3274_s21  ;;  %1451 = vrot.lane.b32.xlu0 %v3596_v20, %s3270_s17 }
 0x15c   :  { %1591 = vrot.lane.b32.xlu1 %v3554_v15, %s3275_s22  ;;  %1597 = vrot.lane.b32.xlu0 %v3596_v20, %s3275_s22 }
 0x160   :  { %1599 = vrot.lane.b32.xlu1 %v3560_v17, %s3275_s22  ;;  %1662 = vrot.lane.b32.xlu0 %v3602_v21, %s3271_s18 }
 0x164   :  { %1664 = vrot.lane.b32.xlu1 %v3554_v15, %s3271_s18  ;;  %1670 = vrot.lane.b32.xlu0 %v3596_v20, %s3271_s18 }
 0x168   :  { %1123 = vrot.lane.b32.xlu1 %v3602_v21, %s3269_s16  ;;  %1127 = vrot.lane.b32.xlu0 %v3627_v24, %s3269_s16 }
 0x16c   :  { %1131 = vrot.lane.b32.xlu1 %v3596_v20, %s3269_s16  ;;  %1135 = vrot.lane.b32.xlu0 %v3636_v27, %s3269_s16 }
 0x170   :  { %1200 = vrot.lane.b32.xlu1 %v3602_v21, %s3272_s19  ;;  %1204 = vrot.lane.b32.xlu0 %v3627_v24, %s3272_s19 }
 0x174   :  { %1208 = vrot.lane.b32.xlu1 %v3596_v20, %s3272_s19  ;;  %1212 = vrot.lane.b32.xlu0 %v3636_v27, %s3272_s19 }
 0x178   :  { %1273 = vrot.lane.b32.xlu1 %v3602_v21, %s3268_s3  ;;  %1350 = vrot.lane.b32.xlu0 %v3627_v24, %s3273_s20 }
 0x17c   :  { %1346 = vrot.lane.b32.xlu1 %v3602_v21, %s3273_s20  ;;  %1358 = vrot.lane.b32.xlu0 %v3636_v27, %s3273_s20 }
 0x180   :  { %1354 = vrot.lane.b32.xlu1 %v3596_v20, %s3273_s20  ;;  %1520 = vrot.lane.b32.xlu0 %v3627_v24, %s3274_s21 }
 0x184   :  { %1516 = vrot.lane.b32.xlu1 %v3602_v21, %s3274_s21  ;;  %1528 = vrot.lane.b32.xlu0 %v3636_v27, %s3274_s21 }
 0x188   :  { %1524 = vrot.lane.b32.xlu1 %v3596_v20, %s3274_s21  ;;  %1668 = vrot.lane.b32.xlu0 %v3544_v13, %s3271_s18 }
 0x18c   :  { %1589 = vrot.lane.b32.xlu1 %v3602_v21, %s3275_s22  ;;  %1735 = vperm.xlu0 %3193, %v66_v35  }
 0x190   :  { %1277 = vrot.lane.b32.xlu1 %v3627_v24, %s3268_s3  ;;  %3196 = vset.pattern.permute.xlu0 %v3259_v1  ;;  %v1150_v1 = vsub.s32 0, %v3704_v50 }
 0x192   :  { %v3696_v40 = vpop.permute.xlu1 %1271  ;;  %v1122_v41 = vpop.permute.xlu0 %1121  ;;  %v3728_v6 = vrot.slane %v3716_v62, %v1150_v1  ;;  %v3731_v8 = vrot.slane %v3721_v63, %v1150_v1  ;;  %v3759_v35 = vrot.slane %v3740_v14, %v1150_v1  ;;  %v3762_v42 = vrot.slane %v3745_v16, %v1150_v1 }
 0x194   :  { %1285 = vrot.lane.b32.xlu1 %v3636_v27, %s3268_s3  ;;  %4712 = vst [vmem:[#allocation17_spill] sm:$0xff] %v3728_v6  ;;  %4713 = vst [vmem:[#allocation18_spill] sm:$0xff] %v3762_v42 }
 0x196   :  { %v3700_v43 = vpop.permute.xlu1 %1441  ;;  %v1130_v44 = vpop.permute.xlu0 %1129 }
 0x198   :  { %1447 = vrot.lane.b32.xlu1 %v3627_v24, %s3270_s17 }
 0x19a   :  { %v3706_v51 = vpop.permute.xlu1 %1660  ;;  %v1199_v52 = vpop.permute.xlu0 %1198 }
 0x19b   :  { %4711 = vst [vmem:[#allocation16_spill] sm:$0xff] %v3706_v51 }
 0x19c   :  { %1455 = vrot.lane.b32.xlu1 %v3636_v27, %s3270_s17 }
 0x19e   :  { %v1126_v3 = vpop.permute.xlu1 %1125  ;;  %v1207_v4 = vpop.permute.xlu0 %1206 }
 0x19f   :  { %v1142_v9 = vsel %vm1139_vm1, %v1126_v3, %v1130_v44  ;;  %v1144_v10 = vsel %vm1139_vm1, %v1122_v41, %v1126_v3 }
 0x1a0   :  { %1593 = vrot.lane.b32.xlu1 %v3627_v24, %s3275_s22  ;;  %v1165_v23 = vmul.f32 %v3728_v6, %v1144_v10  ;;  %v1166_v25 = vmul.f32 %v3731_v8, %v1142_v9 }
 0x1a2   :  { %v1134_v11 = vpop.permute.xlu1 %1133  ;;  %v1280_v12 = vpop.permute.xlu0 %1279 }
 0x1a3   :  { %v1140_v49 = vsel %vm1139_vm1, %v1130_v44, %v1134_v11  ;;  %v1146_v47 = vsel %vm1139_vm1, %v1134_v11, %v1122_v41  ;;  %v3783_v44 = vrot.slane %v3745_v16, %v1225_v5  ;;  %v1183_v41 = vmul.f32 %v3676_v33, %v1165_v23 }
 0x1a4   :  { %1601 = vrot.lane.b32.xlu1 %v3636_v27, %s3275_s22  ;;  %v1184_v11 = vmul.f32 %v3676_v33, %v1166_v25  ;;  %v1164_v45 = vmul.f32 %v3759_v35, %v1146_v47  ;;  %v3797_v23 = vrot.slane %v3721_v63, %v1298_v2 }
 0x1a5   :  { %4714 = vst [vmem:[#allocation19_spill] sm:$0xff] %v3783_v44 }
 0x1a6   :  { %v1203_v3 = vpop.permute.xlu1 %1202  ;;  %v3764_v0 = vpop.permute.xlu0 %1344  ;;  %4715 = vst [vmem:[#allocation20_spill] sm:$0xff] %v3797_v23 }
 0x1a7   :  { %v1217_v9 = vsel %vm1214_vm2, %v1203_v3, %v1207_v4  ;;  %v1219_v10 = vsel %vm1214_vm2, %v1199_v52, %v1203_v3  ;;  %v1167_v3 = vmul.f32 %v3762_v42, %v1140_v49 }
 0x1a8   :  { %v1240_v1 = vmul.f32 %v3751_v18, %v1219_v10  ;;  %v1241_v46 = vmul.f32 %v3754_v19, %v1217_v9  ;;  %1666 = vrot.lane.b32.xlu1 %v3627_v24, %s3271_s18 }
 0x1aa   :  { %v1256_v10 = vmul.f32 %v3642_v28, %v1240_v1  ;;  %v1257_v9 = vmul.f32 %v3642_v28, %v1241_v46  ;;  %v1211_v38 = vpop.permute.xlu1 %1210  ;;  %v1353_v37 = vpop.permute.xlu0 %1352  ;;  %v3804_v46 = vrot.slane %v3716_v62, %v1298_v2 }
 0x1ab   :  { %v1215_v39 = vsel %vm1214_vm2, %v1207_v4, %v1211_v38  ;;  %v1221_v5 = vsel %vm1214_vm2, %v1211_v38, %v1199_v52  ;;  %v1182_v4 = vmul.f32 %v3676_v33, %v1164_v45  ;;  %v1185_v38 = vmul.f32 %v3676_v33, %v1167_v3 }
 0x1ac   :  { %v1264_v47 = vadd.f32 %v1256_v10, %v1183_v41  ;;  %v1265_v25 = vadd.f32 %v1257_v9, %v1184_v11  ;;  %v1239_v49 = vmul.f32 %v3780_v48, %v1221_v5  ;;  %v1242_v1 = vmul.f32 %v3783_v44, %v1215_v39  ;;  %1674 = vrot.lane.b32.xlu1 %v3636_v27, %s3271_s18 }
 0x1ad   :  { %4716 = vst [vmem:[#allocation21_spill] sm:$0xff] %v3804_v46  ;;  %v3818_v9 = vrot.slane %v3745_v16, %v1298_v2 }
 0x1ae   :  { %v1255_v52 = vmul.f32 %v3642_v28, %v1239_v49  ;;  %v1258_v36 = vmul.f32 %v3642_v28, %v1242_v1  ;;  %v1276_v41 = vpop.permute.xlu1 %1275  ;;  %v3810_v11 = vpop.permute.xlu0 %1449  ;;  %v1371_v28 = vsub.s32 3, %v3704_v50  ;;  %v3827_v1 = vrot.slane %v3740_v14, %v1298_v2 }
 0x1af   :  { %v1290_v39 = vsel %vm1287_vm3, %v1276_v41, %v1280_v12  ;;  %v1292_v10 = vsel %vm1287_vm3, %v3696_v40, %v1276_v41  ;;  %4717 = vst [vmem:[#allocation22_spill] sm:$0xff] %v3818_v9 }
 0x1b0   :  { %v1263_v45 = vadd.f32 %v1255_v52, %v1182_v4  ;;  %v1266_v5 = vadd.f32 %v1258_v36, %v1185_v38  ;;  %v1314_v33 = vmul.f32 %v3797_v23, %v1290_v39  ;;  %1672 = vrot.lane.b32.xlu1 %v3560_v17, %s3271_s18  ;;  %v1313_v3 = vmul.f32 %v3804_v46, %v1292_v10 }
 0x1b1   :  { %4718 = vst [vmem:[#allocation23_spill] sm:$0xff] %v3827_v1  ;;  %v3839_v39 = vrot.slane %v3716_v62, %v1371_v28  ;;  %v3842_v2 = vrot.slane %v3721_v63, %v1371_v28 }
 0x1b2   :  { %v1330_v49 = vmul.f32 %v3648_v29, %v1314_v33  ;;  %v1284_v41 = vpop.permute.xlu1 %1283  ;;  %v3829_v58 = vpop.permute.xlu0 %1514  ;;  %v1329_v10 = vmul.f32 %v3648_v29, %v1313_v3 }
 0x1b3   :  { %v1288_v36 = vsel %vm1287_vm3, %v1280_v12, %v1284_v41  ;;  %v1294_v4 = vsel %vm1287_vm3, %v1284_v41, %v3696_v40  ;;  %4719 = vst [vmem:[#allocation24_spill] sm:$0xff] %v3839_v39  ;;  %4720 = vst [vmem:[#allocation25_spill] sm:$0xff] %v3842_v2  ;;  %v1468_v41 = vsub.s32 5, %v3704_v50 }
 0x1b4   :  { %v1338_v38 = vadd.f32 %v1330_v49, %v1265_v25  ;;  %v1315_v52 = vmul.f32 %v3818_v9, %v1288_v36  ;;  %v1312_v33 = vmul.f32 %v3827_v1, %v1294_v4  ;;  %v3855_v49 = vrot.slane %v3740_v14, %v1371_v28 }
 0x1b5   :  { %v1337_v30 = vadd.f32 %v1329_v10, %v1264_v47  ;;  %v3875_v47 = vrot.slane %v3716_v62, %v1468_v41 }
 0x1b6   :  { %v1331_v12 = vmul.f32 %v3648_v29, %v1315_v52  ;;  %v1349_v31 = vpop.permute.xlu1 %1348  ;;  %v3847_v32 = vpop.permute.xlu0 %1522  ;;  %4721 = vst [vmem:[#allocation26_spill] sm:$0xff] %v3855_v49  ;;  %v3861_v52 = vrot.slane %v3745_v16, %v1371_v28  ;;  %v1328_v53 = vmul.f32 %v3648_v29, %v1312_v33 }
 0x1b7   :  { %v1363_v40 = vsel %vm1360_vm4, %v1349_v31, %v1353_v37  ;;  %v1365_v25 = vsel %vm1360_vm4, %v3764_v0, %v1349_v31 }
 0x1b8   :  { %v1339_v3 = vadd.f32 %v1331_v12, %v1266_v5  ;;  %v1386_v36 = vmul.f32 %v3839_v39, %v1365_v25  ;;  %v1387_v4 = vmul.f32 %v3842_v2, %v1363_v40  ;;  %4722 = vst [vmem:[#allocation27_spill] sm:$0xff] %v3861_v52  ;;  %v1426_v40 = vmul.f32 %v3526_v56, %v3554_v15 }
 0x1b9   :  { %v1336_v25 = vadd.f32 %v1328_v53, %v1263_v45  ;;  %v3897_v53 = vrot.slane %v3721_v63, %v1468_v41 }
 0x1ba   :  { %v1402_v9 = vmul.f32 %v3522_v54, %v1386_v36  ;;  %v1403_v31 = vmul.f32 %v3522_v54, %v1387_v4  ;;  %v1357_v1 = vpop.permute.xlu1 %1356  ;;  %v3866_v23 = vpop.permute.xlu0 %1587  ;;  %v3886_v36 = vrot.slane %v3740_v14, %v1468_v41 }
 0x1bb   :  { %v1361_v5 = vsel %vm1360_vm4, %v1353_v37, %v1357_v1  ;;  %v1367_v12 = vsel %vm1360_vm4, %v1357_v1, %v3764_v0  ;;  %v1425_v37 = vmul.f32 %v3526_v56, %v3538_v7  ;;  %v1541_v7 = vsub.s32 6, %v3704_v50 }
 0x1bc   :  { %v1410_v29 = vadd.f32 %v1402_v9, %v1337_v30  ;;  %v1411_v28 = vadd.f32 %v1403_v31, %v1338_v38  ;;  %v1385_v10 = vmul.f32 %v3855_v49, %v1367_v12  ;;  %v1388_v33 = vmul.f32 %v3861_v52, %v1361_v5 }
 0x1bd   :  { %v3902_v31 = vrot.slane %v3745_v16, %v1468_v41  ;;  %v1427_v5 = vmul.f32 %v3526_v56, %v3544_v13  ;;  %v1428_v12 = vmul.f32 %v3526_v56, %v3560_v17  ;;  %v3920_v56 = vrot.slane %v3740_v14, %v1541_v7 }
 0x1be   :  { %v1401_v0 = vmul.f32 %v3522_v54, %v1385_v10  ;;  %v1404_v1 = vmul.f32 %v3522_v54, %v1388_v33  ;;  %v1446_v30 = vpop.permute.xlu1 %1445  ;;  %v3888_v9 = vpop.permute.xlu0 %1595  ;;  %v1434_v33 = vadd.f32 %v1426_v40, %v1410_v29  ;;  %v3925_v40 = vrot.slane %v3716_v62, %v1541_v7 }
 0x1bf   :  { %v1460_v38 = vsel %vm1457_vm5, %v1446_v30, %v3810_v11  ;;  %v1462_v15 = vsel %vm1457_vm5, %v3700_v43, %v1446_v30 }
 0x1c0   :  { %v1409_v54 = vadd.f32 %v1401_v0, %v1336_v25  ;;  %v1412_v45 = vadd.f32 %v1404_v1, %v1339_v3  ;;  %v1483_v4 = vmul.f32 %v3875_v47, %v1460_v38  ;;  %v1482_v30 = vmul.f32 %v3886_v36, %v1462_v15 }
 0x1c2   :  { %v1433_v10 = vadd.f32 %v1425_v37, %v1409_v54  ;;  %v1499_v52 = vmul.f32 %v3528_v57, %v1483_v4  ;;  %v1454_v2 = vpop.permute.xlu1 %1453  ;;  %v3910_v25 = vpop.permute.xlu0 %1281  ;;  %v1435_v37 = vadd.f32 %v1427_v5, %v1411_v28  ;;  %v1498_v0 = vmul.f32 %v3528_v57, %v1482_v30 }
 0x1c3   :  { %v1458_v41 = vsel %vm1457_vm5, %v3810_v11, %v1454_v2  ;;  %v1464_v13 = vsel %vm1457_vm5, %v1454_v2, %v3700_v43  ;;  %v3928_v11 = vrot.slane %v3721_v63, %v1541_v7  ;;  %v1436_v43 = vadd.f32 %v1428_v12, %v1412_v45 }
 0x1c4   :  { %v1507_v17 = vadd.f32 %v1499_v52, %v1434_v33  ;;  %v1484_v3 = vmul.f32 %v3897_v53, %v1458_v41  ;;  %v1485_v29 = vmul.f32 %v3902_v31, %v1464_v13  ;;  %v3942_v54 = vrot.slane %v3745_v16, %v1541_v7 }
 0x1c5   :  { %v1614_v45 = vsub.s32 7, %v3704_v50  ;;  %v1506_v33 = vadd.f32 %v1498_v0, %v1433_v10 }
 0x1c6   :  { %v1500_v2 = vmul.f32 %v3528_v57, %v1484_v3  ;;  %v1501_v1 = vmul.f32 %v3528_v57, %v1485_v29  ;;  %v1519_v38 = vpop.permute.xlu1 %1518  ;;  %v3933_v52 = vpop.permute.xlu0 %1443 }
 0x1c7   :  { %v1533_v15 = vsel %vm1530_vm6, %v1519_v38, %v3847_v32  ;;  %v1535_v28 = vsel %vm1530_vm6, %v3829_v58, %v1519_v38  ;;  %v3959_v29 = vrot.slane %v3740_v14, %v1614_v45  ;;  %v3962_v10 = vrot.slane %v3716_v62, %v1614_v45 }
 0x1c8   :  { %v1508_v4 = vadd.f32 %v1500_v2, %v1435_v37  ;;  %v1509_v5 = vadd.f32 %v1501_v1, %v1436_v43  ;;  %v1555_v57 = vmul.f32 %v3920_v56, %v1535_v28  ;;  %v1556_v12 = vmul.f32 %v3925_v40, %v1533_v15 }
 0x1c9   :  { %4723 = vst [vmem:[#allocation28_spill] sm:$0xff] %v3959_v29  ;;  %4724 = vst [vmem:[#allocation29_spill] sm:$0xff] %v3962_v10  ;;  %v3977_v14 = vrot.slane %v3721_v63, %v1614_v45 }
 0x1ca   :  { %v1571_v30 = vmul.f32 %v3678_v34, %v1555_v57  ;;  %v1572_v41 = vmul.f32 %v3678_v34, %v1556_v12  ;;  %v1527_v13 = vpop.permute.xlu1 %1526  ;;  %v3949_v3 = vpop.permute.xlu0 %1451 }
 0x1cb   :  { %v1531_v50 = vsel %vm1530_vm6, %v3847_v32, %v1527_v13  ;;  %v1537_v7 = vsel %vm1530_vm6, %v1527_v13, %v3829_v58  ;;  %4725 = vst [vmem:[#allocation30_spill] sm:$0xff] %v3977_v14 }
 0x1cc   :  { %v1579_v37 = vadd.f32 %v1571_v30, %v1506_v33  ;;  %v1580_v0 = vadd.f32 %v1572_v41, %v1507_v17  ;;  %v1557_v43 = vmul.f32 %v3928_v11, %v1531_v50  ;;  %v1558_v2 = vmul.f32 %v3942_v54, %v1537_v7  ;;  %v4002_v7 = vld [vmem:[%s4638_s1 + $0x20] ss:$0 sm:$0xff] }
 0x1cd   :  { %v3980_v17 = vrot.slane %v3745_v16, %v1614_v45  ;;  %4728 = vst [vmem:[#allocation33_spill] sm:$0xff] %v4002_v7 }
 0x1ce   :  { %v1573_v1 = vmul.f32 %v3678_v34, %v1557_v43  ;;  %v1574_v32 = vmul.f32 %v3678_v34, %v1558_v2  ;;  %v1592_v38 = vpop.permute.xlu1 %1591  ;;  %v3968_v15 = vpop.permute.xlu0 %1597 }
 0x1cf   :  { %v1606_v58 = vsel %vm1603_vm7, %v1592_v38, %v3888_v9  ;;  %v1608_v62 = vsel %vm1603_vm7, %v3866_v23, %v1592_v38  ;;  %4726 = vst [vmem:[#allocation31_spill] sm:$0xff] %v3980_v17 }
 0x1d0   :  { %v1581_v28 = vadd.f32 %v1573_v1, %v1508_v4  ;;  %v1582_v57 = vadd.f32 %v1574_v32, %v1509_v5  ;;  %v1628_v34 = vmul.f32 %v3959_v29, %v1608_v62  ;;  %v1629_v12 = vmul.f32 %v3962_v10, %v1606_v58 }
 0x1d2   :  { %v1644_v33 = vmul.f32 %v3532_v59, %v1628_v34  ;;  %v1645_v30 = vmul.f32 %v3532_v59, %v1629_v12  ;;  %v1600_v41 = vpop.permute.xlu1 %1599  ;;  %v3986_v13 = vpop.permute.xlu0 %1662 }
 0x1d3   :  { %4727 = vst [vmem:[#allocation32_spill] sm:$0xff] %v3986_v13  ;;  %v1604_v63 = vsel %vm1603_vm7, %v3888_v9, %v1600_v41  ;;  %v1610_v16 = vsel %vm1603_vm7, %v1600_v41, %v3866_v23  ;;  %v4732_v41 = vmov 3  }
 0x1d4   :  { %v1652_v45 = vadd.f32 %v1644_v33, %v1579_v37  ;;  %v3995_v4 = vadd.f32 %v1645_v30, %v1580_v0  ;;  %v1630_v5 = vmul.f32 %v3977_v14, %v1604_v63  ;;  %v1631_v50 = vmul.f32 %v3980_v17, %v1610_v16  ;;  %v1761_v33 = vld [vmem:[%s4645_s8] sm:$0xff] }
 0x1d5   :  { %2841 = vperm.xlu0 %3196, %v1761_v33   ;;  %v4733_v63 = vmov 1  }
 0x1d6   :  { %v1646_v9 = vmul.f32 %v3532_v59, %v1630_v5  ;;  %v1647_v43 = vmul.f32 %v3532_v59, %v1631_v50  ;;  %v1665_v2 = vpop.permute.xlu1 %1664  ;;  %v4006_v23 = vpop.permute.xlu0 %1670  ;;  %v4734_v5 = vmov 4   ;;  %v4735_v50 = vmov 6  }
 0x1d7   :  { %4729 = vst [vmem:[#allocation34_spill] sm:$0xff] %v4006_v23  ;;  %v1681_v37 = vsel %vm1676_vm8, %v3706_v51, %v1665_v2  ;;  %v4046_v51 = vld [vmem:[%s4638_s1 + $0x28] ss:$0 sm:$0xff] }
 0x1d8   :  { %v4011_v0 = vadd.f32 %v1646_v9, %v1581_v28  ;;  %v4013_v1 = vadd.f32 %v1647_v43, %v1582_v57  ;;  %v1701_v32 = vmul.f32 %v4002_v7, %v1681_v37  ;;  %v1760_v28 = vld [vmem:[%s4644_s7] sm:$0xff]  ;;  %4740 = vst [vmem:[#allocation37_spill] sm:$0xff] %v4046_v51 }
 0x1d9   :  { %1765 = vperm.xlu1 %3194, %v1760_v28   ;;  %3197 = vset.pattern.permute.xlu0 %v4732_v41  ;;  %v4737_v28 = vmov 7  }
 0x1da   :  { %4730 = vst [vmem:[#allocation35_spill] sm:$0xff] %v4011_v0  ;;  %4731 = vst [vmem:[#allocation36_spill] sm:$0xff] %v4013_v1  ;;  %v1717_v38 = vmul.f32 %v3534_v60, %v1701_v32  ;;  %v1124_v58 = vpop.permute.xlu1 %1123  ;;  %v1128_v62 = vpop.permute.xlu0 %1127  ;;  %2869 = vperm.xlu0 %3197, %v1761_v33   ;;  %v4739_v0 = vmov 0  }
 0x1db   :  { %v1145_v13 = vsel %vm1139_vm1, %v1124_v58, %v1128_v62 }
 0x1dc   :  { %v4017_v34 = vadd.f32 %v1717_v38, %v1652_v45  ;;  %v4736_v38 = vmov 5  }
 0x1dd   :  { %3195 = vset.pattern.permute.xlu1 %v4733_v63 }
 0x1de   :  { %v1132_v59 = vpop.permute.xlu1 %1131  ;;  %v1136_v12 = vpop.permute.xlu0 %1135  ;;  %2813 = vperm.xlu1 %3195, %v1761_v33   ;;  %3198 = vset.pattern.permute.xlu0 %v4734_v5  ;;  %v4738_v5 = vmov 8  }
 0x1df   :  { %2881 = vperm.xlu0 %3198, %v1761_v33   ;;  %v1147_v23 = vsel %vm1139_vm1, %v1136_v12, %v1124_v58 }
 0x1e0   :  { %v1168_v29 = vmul.f32 %v3759_v35, %v1147_v23 }
 0x1e2   :  { %v1201_v57 = vpop.permute.xlu1 %1200  ;;  %v1205_v30 = vpop.permute.xlu0 %1204  ;;  %3200 = vset.pattern.permute.xlu1 %v4735_v50 }
 0x1e3   :  { %2937 = vperm.xlu1 %3200, %v1761_v33   ;;  %3199 = vset.pattern.permute.xlu0 %v4736_v38 }
 0x1e4   :  { %2909 = vperm.xlu0 %3199, %v1761_v33  }
 0x1e6   :  { %v1209_v16 = vpop.permute.xlu1 %1208  ;;  %v1213_v45 = vpop.permute.xlu0 %1212 }
 0x1e7   :  { %3201 = vset.pattern.permute.xlu1 %v4737_v28  ;;  %v1222_v17 = vsel %vm1214_vm2, %v1213_v45, %v1201_v57  ;;  %v1218_v14 = vsel %vm1214_vm2, %v1205_v30, %v1209_v16 }
 0x1e8   :  { %2965 = vperm.xlu1 %3201, %v1761_v33   ;;  %3202 = vset.pattern.permute.xlu0 %v4738_v5  ;;  %v1245_v23 = vmul.f32 %v3754_v19, %v1218_v14 }
 0x1e9   :  { %2993 = vperm.xlu0 %3202, %v1761_v33  }
 0x1ea   :  { %v4029_v9 = vpop.permute.xlu1 %1273  ;;  %v4031_v43 = vpop.permute.xlu0 %1350 }
 0x1ed   :  { %3203 = vset.pattern.permute.xlu0 %v4739_v0  ;;  %v1759_v0 = vld [vmem:[%s4643_s6] sm:$0xff] }
 0x1ee   :  { %v1347_v37 = vpop.permute.xlu1 %1346  ;;  %v4033_v32 = vpop.permute.xlu0 %1358  ;;  %2785 = vperm.xlu0 %3203, %v1761_v33   ;;  %v1143_v33 = vsel %vm1139_vm1, %v1128_v62, %v1132_v59  ;;  %v1770_v10 = vsel %vm1768_vm9, %v1759_v0, 0 }
 0x1ef   :  { %v1170_v58 = vmul.f32 %v3731_v8, %v1143_v33  ;;  %v4111_v14 = vand.u32 4294901760, %v1770_v10 }
 0x1f2   :  { %v1355_v41 = vpop.permute.xlu1 %1354  ;;  %v4037_v63 = vpop.permute.xlu0 %1520 }
 0x1f6   :  { %v1517_v50 = vpop.permute.xlu1 %1516  ;;  %v4040_v1 = vpop.permute.xlu0 %1528 }
 0x1fa   :  { %v4048_v38 = vpop.permute.xlu1 %1524  ;;  %v4050_v28 = vpop.permute.xlu0 %1668 }
 0x1fb   :  { %4741 = vst [vmem:[#allocation38_spill] sm:$0xff] %v4050_v28  ;;  %v1679_v5 = vsel %vm1676_vm8, %v1665_v2, %v4050_v28  ;;  %v1220_v28 = vsel %vm1214_vm2, %v1201_v57, %v1205_v30  ;;  %v1141_v57 = vsel %vm1139_vm1, %v1132_v59, %v1136_v12  ;;  %v4092_v30 = vmul.f32 %v3524_v55, %v3596_v20 }
 0x1fc   :  { %v1702_v7 = vmul.f32 %v4046_v51, %v1679_v5  ;;  %v1169_v51 = vmul.f32 %v3728_v6, %v1145_v13  ;;  %v1244_v13 = vmul.f32 %v3751_v18, %v1220_v28  ;;  %v4100_v59 = vmul.f32 %v3524_v55, %v3627_v24 }
 0x1fd   :  { %v4104_v12 = vmul.f32 %v3524_v55, %v3636_v27  ;;  %v1171_v28 = vmul.f32 %v3762_v42, %v1141_v57  ;;  %v1186_v24 = vmul.f32 %v3620_v22, %v1168_v29  ;;  %v1366_v27 = vsel %vm1360_vm4, %v1347_v37, %v4031_v43 }
 0x1fe   :  { %v1718_v2 = vmul.f32 %v3534_v60, %v1702_v7  ;;  %v4068_v5 = vpop.permute.xlu1 %1589  ;;  %v1216_v7 = vsel %vm1214_vm2, %v1209_v16, %v1213_v45  ;;  %v1243_v60 = vmul.f32 %v3780_v48, %v1222_v17  ;;  %v1188_v45 = vmul.f32 %v3620_v22, %v1170_v58  ;;  %v4742_v58 = vld [vmem:[#allocation20_spill] sm:$0xff] }
 0x1ff   :  { %v1246_v16 = vmul.f32 %v3783_v44, %v1216_v7  ;;  %v1390_v42 = vmul.f32 %v3839_v39, %v1366_v27  ;;  %v4744_v44 = vld [vmem:[#allocation22_spill] sm:$0xff]  ;;  %v4747_v27 = vld [vmem:[#allocation27_spill] sm:$0xff] }
 0x200   :  { %v4076_v62 = vadd.f32 %v1718_v2, %v3995_v4  ;;  %v4088_v4 = vmul.f32 %v3524_v55, %v3602_v21  ;;  %v1187_v21 = vmul.f32 %v3620_v22, %v1169_v51  ;;  %v1259_v0 = vmul.f32 %v3630_v26, %v1243_v60 }
 0x201   :  { %v1260_v55 = vmul.f32 %v3630_v26, %v1244_v13  ;;  %v1368_v51 = vsel %vm1360_vm4, %v4033_v32, %v1347_v37  ;;  %v1261_v2 = vmul.f32 %v3630_v26, %v1245_v23  ;;  %v1262_v57 = vmul.f32 %v3630_v26, %v1246_v16  ;;  %v4743_v23 = vld [vmem:[#allocation23_spill] sm:$0xff] }
 0x202   :  { %v1278_v6 = vpop.permute.xlu1 %1277  ;;  %v1362_v37 = vsel %vm1360_vm4, %v1355_v41, %v4033_v32  ;;  %v1364_v13 = vsel %vm1360_vm4, %v4031_v43, %v1355_v41  ;;  %v1536_v26 = vsel %vm1530_vm6, %v1517_v50, %v4037_v63  ;;  %v4745_v32 = vld [vmem:[#allocation8_spill] sm:$0xff] }
 0x203   :  { %v1293_v17 = vsel %vm1287_vm3, %v4029_v9, %v1278_v6  ;;  %v1291_v20 = vsel %vm1287_vm3, %v1278_v6, %v3910_v25  ;;  %v1269_v39 = vadd.f32 %v1261_v2, %v1188_v45 }
 0x204   :  { %v1317_v6 = vmul.f32 %v3804_v46, %v1293_v17  ;;  %v1318_v7 = vmul.f32 %v4742_v58, %v1291_v20  ;;  %v1267_v20 = vadd.f32 %v1259_v0, %v1186_v24  ;;  %v4746_v24 = vld [vmem:[#allocation25_spill] sm:$0xff] }
 0x205   :  { %v1391_v0 = vmul.f32 %v4746_v24, %v1364_v13 }
 0x206   :  { %v1286_v33 = vpop.permute.xlu1 %1285  ;;  %v1333_v16 = vmul.f32 %v4745_v32, %v1317_v6 }
 0x207   :  { %v1289_v60 = vsel %vm1287_vm3, %v3910_v25, %v1286_v33  ;;  %v1295_v29 = vsel %vm1287_vm3, %v1286_v33, %v4029_v9  ;;  %v1389_v25 = vmul.f32 %v3855_v49, %v1368_v51  ;;  %v1538_v9 = vsel %vm1530_vm6, %v4040_v1, %v1517_v50 }
 0x208   :  { %v1316_v17 = vmul.f32 %v4743_v23, %v1295_v29  ;;  %v1319_v46 = vmul.f32 %v4744_v44, %v1289_v60  ;;  %v1392_v33 = vmul.f32 %v4747_v27, %v1362_v37  ;;  %v1334_v51 = vmul.f32 %v4745_v32, %v1318_v7  ;;  %v4748_v7 = vld [vmem:[#allocation11_spill] sm:$0xff] }
 0x209   :  { %v4156_v60 = vsub.f32 %v1770_v10, %v4111_v14  ;;  %v1189_v29 = vmul.f32 %v3620_v22, %v1171_v28  ;;  %v1268_v44 = vadd.f32 %v1260_v55, %v1187_v21  ;;  %v1559_v50 = vmul.f32 %v3920_v56, %v1536_v26 }
 0x20a   :  { %v1332_v43 = vmul.f32 %v4745_v32, %v1316_v17  ;;  %v1448_v41 = vpop.permute.xlu1 %1447  ;;  %v1562_v6 = vmul.f32 %v3942_v54, %v1538_v9  ;;  %v1335_v17 = vmul.f32 %v4745_v32, %v1319_v46  ;;  %v1406_v27 = vmul.f32 %v4748_v7, %v1390_v42 }
 0x20b   :  { %v1461_v37 = vsel %vm1457_vm5, %v1448_v41, %v3949_v3  ;;  %v1270_v13 = vadd.f32 %v1262_v57, %v1189_v29  ;;  %v1405_v10 = vmul.f32 %v4748_v7, %v1389_v25  ;;  %v1341_v23 = vadd.f32 %v1333_v16, %v1268_v44  ;;  %v4167_v22 = vpop.permute.xlu0 %1735 }
 0x20c   :  { %v1340_v49 = vadd.f32 %v1332_v43, %v1267_v20  ;;  %v1407_v45 = vmul.f32 %v4748_v7, %v1391_v0  ;;  %v1408_v28 = vmul.f32 %v4748_v7, %v1392_v33  ;;  %v1342_v55 = vadd.f32 %v1334_v51, %v1269_v39  ;;  %v4749_v20 = vld [vmem:[#allocation13_spill] sm:$0xff]  ;;  %v4750_v33 = vld [vmem:[#allocation12_spill] sm:$0xff] }
 0x20d   :  { %v1463_v46 = vsel %vm1457_vm5, %v3933_v52, %v1448_v41  ;;  %v1487_v57 = vmul.f32 %v3875_v47, %v1461_v37  ;;  %v1575_v25 = vmul.f32 %v4749_v20, %v1559_v50  ;;  %v1578_v26 = vmul.f32 %v4749_v20, %v1562_v6 }
 0x20e   :  { %v1456_v21 = vpop.permute.xlu1 %1455  ;;  %v1413_v2 = vadd.f32 %v1405_v10, %v1340_v49  ;;  %v1343_v39 = vadd.f32 %v1335_v17, %v1270_v13  ;;  %v1743_v9 = vadd.f32 %v4167_v22, %v4017_v34  ;;  %v1532_v49 = vsel %vm1530_vm6, %v4048_v38, %v4040_v1  ;;  %v4752_v13 = vld [vmem:[#allocation29_spill] sm:$0xff] }
 0x20f   :  { %v1459_v42 = vsel %vm1457_vm5, %v3949_v3, %v1456_v21  ;;  %v1465_v44 = vsel %vm1457_vm5, %v1456_v21, %v3933_v52  ;;  %v1534_v3 = vsel %vm1530_vm6, %v4037_v63, %v4048_v38  ;;  %v1414_v32 = vadd.f32 %v1406_v27, %v1341_v23 }
 0x210   :  { %v1486_v52 = vmul.f32 %v3886_v36, %v1463_v46  ;;  %v1415_v43 = vadd.f32 %v1407_v45, %v1342_v55  ;;  %v1488_v41 = vmul.f32 %v3897_v53, %v1459_v42  ;;  %v1489_v0 = vmul.f32 %v3902_v31, %v1465_v44  ;;  %v4753_v44 = vld [vmem:[#allocation30_spill] sm:$0xff] }
 0x211   :  { %v1437_v1 = vadd.f32 %v4088_v4, %v1413_v2  ;;  %v1503_v51 = vmul.f32 %v4750_v33, %v1487_v57  ;;  %v1744_v63 = vadd.f32 %v4167_v22, %v4076_v62  ;;  %v1560_v23 = vmul.f32 %v3925_v40, %v1534_v3  ;;  %v4751_v4 = vld [vmem:[#allocation28_spill] sm:$0xff] }
 0x212   :  { %v1594_v16 = vpop.permute.xlu1 %1593  ;;  %v1561_v27 = vmul.f32 %v3928_v11, %v1532_v49  ;;  %v1416_v29 = vadd.f32 %v1408_v28, %v1343_v39  ;;  %v1751_v50 = vmax.f32 %v1743_v9, 0.0  ;;  %v1438_v6 = vadd.f32 %v4100_v59, %v1414_v32  ;;  %v4754_v9 = vld [vmem:[#allocation31_spill] sm:$0xff]  ;;  %v4755_v32 = vld [vmem:[#allocation9_spill] sm:$0xff] }
 0x213   :  { %v1607_v34 = vsel %vm1603_vm7, %v1594_v16, %v3968_v15  ;;  %v1609_v38 = vsel %vm1603_vm7, %v4068_v5, %v1594_v16  ;;  %v1502_v17 = vmul.f32 %v4750_v33, %v1486_v52  ;;  %v1504_v62 = vmul.f32 %v4750_v33, %v1488_v41 }
 0x214   :  { %v1632_v37 = vmul.f32 %v4751_v4, %v1609_v38  ;;  %v1633_v7 = vmul.f32 %v4752_v13, %v1607_v34  ;;  %v1505_v21 = vmul.f32 %v4750_v33, %v1489_v0  ;;  %v1511_v55 = vadd.f32 %v1503_v51, %v1438_v6  ;;  %v4758_v51 = vld [vmem:[#allocation33_spill] sm:$0xff]  ;;  %v4246_v6 = vld [vmem:[%s4638_s1 + $0x30] ss:$0 sm:$0xff] }
 0x215   :  { %v1510_v59 = vadd.f32 %v1502_v17, %v1437_v1  ;;  %v1752_v46 = vmax.f32 %v1744_v63, 0.0  ;;  %v1439_v2 = vadd.f32 %v4092_v30, %v1415_v43  ;;  %v4221_v57 = vand.u32 4294901760, %v1751_v50  ;;  %v4756_v30 = vld [vmem:[#allocation34_spill] sm:$0xff]  ;;  %4760 = vst [vmem:[#allocation20_spill] sm:$0xff] %v4246_v6 }
 0x216   :  { %v1602_v10 = vpop.permute.xlu1 %1601  ;;  %v1440_v42 = vadd.f32 %v4104_v12, %v1416_v29  ;;  %v1576_v3 = vmul.f32 %v4749_v20, %v1560_v23  ;;  %v1648_v52 = vmul.f32 %v4755_v32, %v1632_v37  ;;  %v4757_v12 = vld [vmem:[#allocation32_spill] sm:$0xff] }
 0x217   :  { %v1605_v45 = vsel %vm1603_vm7, %v3968_v15, %v1602_v10  ;;  %v1611_v28 = vsel %vm1603_vm7, %v1602_v10, %v4068_v5  ;;  %v1577_v15 = vmul.f32 %v4749_v20, %v1561_v27  ;;  %v1649_v5 = vmul.f32 %v4755_v32, %v1633_v7  ;;  %v4759_v20 = vld [vmem:[#allocation37_spill] sm:$0xff]  ;;  %v4762_v10 = vld [vmem:[#allocation14_spill] sm:$0xff] }
 0x218   :  { %v1634_v39 = vmul.f32 %v4753_v44, %v1605_v45  ;;  %v1635_v49 = vmul.f32 %v4754_v9, %v1611_v28  ;;  %v1512_v41 = vadd.f32 %v1504_v62, %v1439_v2  ;;  %v1513_v0 = vadd.f32 %v1505_v21, %v1440_v42 }
 0x219   :  { %v1583_v1 = vadd.f32 %v1575_v25, %v1510_v59  ;;  %v1584_v33 = vadd.f32 %v1576_v3, %v1511_v55  ;;  %v4239_v23 = vsub.f32 %v1751_v50, %v4221_v57  ;;  %v4251_v25 = vld [vmem:[%s4638_s1 + $0x38] ss:$0 sm:$0xff]  ;;  %v1785_v17 = vand.u32 4294901760, %v1752_v46 }
 0x21a   :  { %v1667_v16 = vpop.permute.xlu1 %1666  ;;  %v1650_v27 = vmul.f32 %v4755_v32, %v1634_v39  ;;  %v1651_v29 = vmul.f32 %v4755_v32, %v1635_v49  ;;  %4761 = vst [vmem:[#allocation8_spill] sm:$0xff] %v4251_v25  ;;  %v1585_v45 = vadd.f32 %v1577_v15, %v1512_v41  ;;  %v1586_v28 = vadd.f32 %v1578_v26, %v1513_v0  ;;  %v4763_v15 = vld [vmem:[#allocation15_spill] sm:$0xff] }
 0x21b   :  { %v1680_v43 = vsel %vm1676_vm8, %v1667_v16, %v4756_v30  ;;  %v1682_v34 = vsel %vm1676_vm8, %v4757_v12, %v1667_v16  ;;  %v1656_v37 = vadd.f32 %v1648_v52, %v1583_v1  ;;  %v1657_v7 = vadd.f32 %v1649_v5, %v1584_v33 }
 0x21c   :  { %v1705_v63 = vmul.f32 %v4758_v51, %v1682_v34  ;;  %v1706_v38 = vmul.f32 %v4759_v20, %v1680_v43  ;;  %v1658_v3 = vadd.f32 %v1650_v27, %v1585_v45  ;;  %v1659_v32 = vadd.f32 %v1651_v29, %v1586_v28  ;;  %v4764_v43 = vld [vmem:[#allocation38_spill] sm:$0xff]  ;;  %v4765_v34 = vld [vmem:[#allocation16_spill] sm:$0xff] }
 0x21d   :  { %v4263_v52 = vsub.f32 %v1752_v46, %v1785_v17  ;;  %v4266_v26 = vand.u32 4294901760, %v4156_v60  ;;  %v1873_v1 = vand.u32 4294901760, %v4239_v23 }
 0x21e   :  { %v1721_v50 = vmul.f32 %v4762_v10, %v1705_v63  ;;  %v1722_v62 = vmul.f32 %v4762_v10, %v1706_v38  ;;  %v1675_v21 = vpop.permute.xlu1 %1674 }
 0x21f   :  { %v1678_v59 = vsel %vm1676_vm8, %v4756_v30, %v1675_v21  ;;  %v1684_v55 = vsel %vm1676_vm8, %v1675_v21, %v4757_v12 }
 0x220   :  { %v1729_v2 = vadd.f32 %v1721_v50, %v1656_v37  ;;  %v1730_v42 = vadd.f32 %v1722_v62, %v1657_v7  ;;  %v1707_v39 = vmul.f32 %v4246_v6, %v1678_v59  ;;  %v1708_v49 = vmul.f32 %v4251_v25, %v1684_v55  ;;  %v4766_v62 = vld [vmem:[#allocation10_spill] sm:$0xff] }
 0x221   :  { %v1857_v37 = vsub.f32 %v4156_v60, %v4266_v26  ;;  %v1867_v7 = vand.u32 4294901760, %v4263_v52 }
 0x222   :  { %v1747_v5 = vadd.f32 %v4763_v15, %v1729_v2  ;;  %v1748_v16 = vadd.f32 %v4763_v15, %v1730_v42  ;;  %v1723_v41 = vmul.f32 %v4762_v10, %v1707_v39  ;;  %v1724_v0 = vmul.f32 %v4762_v10, %v1708_v49  ;;  %v1673_v30 = vpop.permute.xlu1 %1672  ;;  %v4767_v39 = vld [vmem:[#allocation35_spill] sm:$0xff] }
 0x223   :  { %v1677_v12 = vsel %vm1676_vm8, %v4764_v43, %v1673_v30  ;;  %v1683_v46 = vsel %vm1676_vm8, %v1673_v30, %v4765_v34  ;;  %v1874_v2 = vsub.f32 %v4239_v23, %v1873_v1 }
 0x224   :  { %v1755_v33 = vmax.f32 %v1747_v5, 0.0  ;;  %v1731_v51 = vadd.f32 %v1723_v41, %v1658_v3  ;;  %v1732_v63 = vadd.f32 %v1724_v0, %v1659_v32  ;;  %v1703_v38 = vmul.f32 %v4246_v6, %v1677_v12  ;;  %v4768_v5 = vld [vmem:[#allocation36_spill] sm:$0xff] }
 0x225   :  { %v1704_v27 = vmul.f32 %v4251_v25, %v1683_v46  ;;  %v1756_v29 = vmax.f32 %v1748_v16, 0.0  ;;  %v1868_v0 = vsub.f32 %v4263_v52, %v1867_v7 }
 0x226   :  { %v1749_v10 = vadd.f32 %v4763_v15, %v1731_v51  ;;  %v1750_v50 = vadd.f32 %v4763_v15, %v1732_v63  ;;  %v1719_v21 = vmul.f32 %v4766_v62, %v1703_v38  ;;  %v1774_v45 = vsel %vm1772_vm10, %v1755_v33, 0 }
 0x227   :  { %v1720_v28 = vmul.f32 %v4766_v62, %v1704_v27  ;;  %v1777_v59 = vsel %vm1772_vm10, %v1756_v29, 0  ;;  %v1791_v55 = vand.u32 4294901760, %v1774_v45  ;;  %v1858_v38 = vand.u32 4294901760, %v1857_v37 }
 0x228   :  { %v1757_v42 = vmax.f32 %v1749_v10, 0.0  ;;  %v1727_v49 = vadd.f32 %v1719_v21, %v4767_v39  ;;  %v1789_v3 = vand.u32 4294901760, %v1777_v59  ;;  %v1758_v32 = vmax.f32 %v1750_v50, 0.0 }
 0x229   :  { %v1728_v15 = vadd.f32 %v1720_v28, %v4768_v5  ;;  %v4296_v16 = vpack.c.bf16 %v1791_v55, %v4221_v57  ;;  %v4298_v41 = vsub.f32 %v1774_v45, %v1791_v55  ;;  %v1875_v45 = vand.u32 4294901760, %v1874_v2 }
 0x22a   :  { %v1745_v30 = vadd.f32 %v4167_v22, %v1727_v49  ;;  %v4304_v43 = vpack.c.bf16 %v1789_v3, %v1785_v17  ;;  %v4306_v12 = vsub.f32 %v1777_v59, %v1789_v3  ;;  %v1783_v34 = vsel %vm1772_vm10, %v1758_v32, 0 }
 0x22b   :  { %v1746_v46 = vadd.f32 %v4167_v22, %v1728_v15  ;;  %v2280_v33 = vand.u32 4294901760, %v1783_v34  ;;  %v1780_v57 = vsel %vm1772_vm10, %v1757_v42, 0  ;;  %v1885_v51 = vand.u32 4294901760, %v4298_v41 }
 0x22c   :  { %v1753_v63 = vmax.f32 %v1745_v30, 0.0  ;;  %3041 = vmatprep.subr.bf16.mxu0 %v4304_v43  ;;  %v1879_v27 = vand.u32 4294901760, %v4306_v12  ;;  %v2282_v29 = vand.u32 4294901760, %v1780_v57  ;;  %v1869_v59 = vand.u32 4294901760, %v1868_v0 }
 0x22d   :  { %3043 = vmatpush1.bf16.msra.mxu0 %v4296_v16  ;;  %v1754_v17 = vmax.f32 %v1746_v46, 0.0  ;;  %v2369_v10 = vsub.f32 %v1783_v34, %v2280_v33  ;;  %v1886_v22 = vsub.f32 %v4298_v41, %v1885_v51  ;;  %v4769_v30 = vmov 0.0  }
 0x22e   :  { %v1880_v50 = vsub.f32 %v4306_v12, %v1879_v27  ;;  %v2278_v62 = vand.u32 4294901760, %v1753_v63  ;;  %v4319_v21 = vsub.f32 %v1780_v57, %v2282_v29 }
 0x22f   :  { %v2276_v28 = vand.u32 4294901760, %v1754_v17  ;;  %v1887_v37 = vand.u32 4294901760, %v1886_v22  ;;  %v2370_v55 = vand.u32 4294901760, %v2369_v10 }
 0x230   :  { %1859 = vmatmul.mubr.f32.vlgmr.msra.gmra.mrb[4].mxu0 %v1858_v38  ;;  %v1881_v42 = vand.u32 4294901760, %v1880_v50  ;;  %v4321_v39 = vpack.c.bf16 %v2282_v29, %v2278_v62  ;;  %v2363_v49 = vsub.f32 %v1753_v63, %v2278_v62  ;;  %v2376_v3 = vand.u32 4294901760, %v4319_v21 }
 0x231   :  { %v3064_v32 = vpack.c.bf16 %v2280_v33, %v2276_v28  ;;  %v2357_v5 = vsub.f32 %v1754_v17, %v2276_v28  ;;  %v3046_v15 = vpack.c.bf16 %v1887_v37, %v1875_v45  ;;  %1949 = vmatprep.mubr.f32.mxu0 %v4769_v30  ;;  %v2371_v57 = vsub.f32 %v2369_v10, %v2370_v55 }
 0x232   :  { %v3044_v34 = vpack.c.bf16 %v1881_v42, %v1869_v59  ;;  %v2364_v46 = vand.u32 4294901760, %v2363_v49  ;;  %v2377_v2 = vsub.f32 %v4319_v21, %v2376_v3  ;;  %v3048_v63 = vpack.c.bf16 %v4306_v12, %v4263_v52 }
 0x233   :  { %3065 = vmatprep.subr.bf16.mxu1 %v3064_v32  ;;  %v2358_v0 = vand.u32 4294901760, %v2357_v5  ;;  %v3050_v50 = vpack.c.bf16 %v4298_v41, %v4239_v23  ;;  %v2372_v45 = vand.u32 4294901760, %v2371_v57  ;;  %v3072_v12 = vpack.c.bf16 %v2369_v10, %v2357_v5 }
 0x234   :  { %3045 = vmatprep.subr.bf16.mxu0 %v3044_v34  ;;  %3067 = vmatpush1.bf16.msra.mxu1 %v4321_v39  ;;  %v2365_v29 = vsub.f32 %v2363_v49, %v2364_v46  ;;  %v2378_v22 = vand.u32 4294901760, %v2377_v2  ;;  %v3056_v37 = vpack.c.bf16 %v1879_v27, %v1867_v7  ;;  %v3058_v10 = vpack.c.bf16 %v1885_v51, %v1873_v1  ;;  %v1762_v51 = vld [vmem:[%s4646_s9] sm:$0xff] }
 0x235   :  { %3047 = vmatpush1.bf16.msra.mxu0 %v3046_v15  ;;  %v2359_v33 = vsub.f32 %v2357_v5, %v2358_v0  ;;  %v3082_v52 = vpack.c.bf16 %v2376_v3, %v2364_v46 }
 0x236   :  { %3049 = vmatprep.subr.bf16.mxu0 %v3048_v63  ;;  %v2366_v17 = vand.u32 4294901760, %v2365_v29 }
 0x237   :  { %2350 = vmatmul.mubr.f32.vlgmr.msra.gmra.mrb[4].mxu1 %v1858_v38  ;;  %v2360_v62 = vand.u32 4294901760, %v2359_v33  ;;  %v3074_v38 = vpack.c.bf16 %v4319_v21, %v2363_v49  ;;  %v3080_v21 = vpack.c.bf16 %v2370_v55, %v2358_v0 }
 0x238   :  { %1951 = vmatmul.mubr.f32.vlgmr.msra.gmra.mrb[4].mxu0 %v4111_v14  ;;  %v3070_v28 = vpack.c.bf16 %v2378_v22, %v2366_v17  ;;  %2440 = vmatprep.mubr.f32.mxu1 %v4769_v30 }
 0x239   :  { %3051 = vmatpush1.bf16.msra.mxu0 %v3050_v50  ;;  %v3068_v59 = vpack.c.bf16 %v2372_v45, %v2360_v62  ;;  %2029 = vmatprep.mubr.f32.mxu0 %v4769_v30 }
 0x23a   :  { %3053 = vmatprep.subr.bf16.mxu0 %v4304_v43 }
 0x23b   :  { %3069 = vmatprep.subr.bf16.mxu1 %v3068_v59 }
 0x23c   :  { %3071 = vmatpush1.bf16.msra.mxu1 %v3070_v28 }
 0x23d   :  { %3073 = vmatprep.subr.bf16.mxu1 %v3072_v12 }
 0x23f   :  { %2442 = vmatmul.mubr.f32.vlgmr.msra.gmra.mrb[4].mxu1 %v4111_v14 }
 0x240   :  { %2032 = vmatmul.mubr.f32.vlgmr.msra.gmra.mrb[4].mxu0 %v4156_v60  ;;  %3075 = vmatpush1.bf16.msra.mxu1 %v3074_v38 }
 0x241   :  { %3055 = vmatpush1.bf16.msra.mxu0 %v4296_v16  ;;  %3077 = vmatprep.subr.bf16.mxu1 %v3064_v32 }
 0x242   :  { %3057 = vmatprep.subr.bf16.mxu0 %v3056_v37  ;;  %2520 = vmatprep.mubr.f32.mxu1 %v4769_v30 }
 0x243   :  { %2106 = vmatprep.mubr.f32.mxu0 %v4769_v30 }
 0x247   :  { %2523 = vmatmul.mubr.f32.vlgmr.msra.gmra.mrb[4].mxu1 %v4156_v60 }
 0x248   :  { %3079 = vmatpush1.bf16.msra.mxu1 %v4321_v39  ;;  %2110 = vmatmul.mubr.f32.vlgmr.msra.gmra.mrb[4].mxu0 %v4266_v26 }
 0x249   :  { %3059 = vmatpush1.bf16.msra.mxu0 %v3058_v10  ;;  %3081 = vmatprep.subr.bf16.mxu1 %v3080_v21 }
 0x24a   :  { %3061 = vmatprep.subr.bf16.mxu0 %v4304_v43  ;;  %2597 = vmatprep.mubr.f32.mxu1 %v4769_v30 }
 0x24b   :  { %2192 = vmatprep.mubr.f32.mxu0 %v4769_v30 }
 0x24f   :  { %2601 = vmatmul.mubr.f32.vlgmr.msra.gmra.mrb[4].mxu1 %v4266_v26 }
 0x250   :  { %3083 = vmatpush1.bf16.msra.mxu1 %v3082_v52  ;;  %2194 = vmatmul.mubr.f32.vlgmr.msra.gmra.mrb[4].mxu0 %v4111_v14 }
 0x251   :  { %3063 = vmatpush1.bf16.msra.mxu0 %v4296_v16  ;;  %3085 = vmatprep.subr.bf16.mxu1 %v3064_v32 }
 0x252   :  { %2683 = vmatprep.mubr.f32.mxu1 %v4769_v30  ;;  %2268 = vmatprep.mubr.f32.mxu0 %v4769_v30 }
 0x254   :  { %v4438_v27 = vpop.permute.xlu0 %2841 }
 0x257   :  { %2685 = vmatmul.mubr.f32.vlgmr.msra.gmra.mrb[4].mxu1 %v4111_v14 }
 0x258   :  { %3087 = vmatpush1.bf16.msra.mxu1 %v4321_v39  ;;  %2270 = vmatmul.mubr.f32.vlgmr.msra.gmra.mrb[4].mxu0 %v4111_v14  ;;  %v1766_v60 = vpop.permute.xlu1 %1765 }
 0x259   :  { %2759 = vmatprep.mubr.f32.mxu1 %v4769_v30  ;;  %v4440_v55 = vpop.permute.xlu0 %2869 }
 0x25d   :  { %v4444_v39 = vpop.permute.xlu1 %2813 }
 0x25e   :  { %v4442_v42 = vpop.permute.xlu0 %2881 }
 0x25f   :  { %2761 = vmatmul.mubr.f32.vlgmr.msra.gmra.mrb[4].mxu1 %v4111_v14 }
 0x262   :  { %v4448_v3 = vpop.permute.xlu1 %2937 }
 0x263   :  { %v4446_v49 = vpop.permute.xlu0 %2909 }
 0x267   :  { %v4452_v5 = vpop.permute.xlu1 %2965 }
 0x268   :  { %v4450_v32 = vpop.permute.xlu0 %2993  ;;  %4771 = vst [vmem:[#allocation11_spill] sm:$0xff] %v4452_v5 }
 0x269   :  { %4770 = vst [vmem:[#allocation25_spill] sm:$0xff] %v4450_v32 }
 0x26d   :  { %v4454_v15 = vpop.permute.xlu0 %2785 }
 0x32b   :  { %v2271_v23 = vpop.f32.mrb[4].mxu0 }
 0x32c   :  { %v4363_v26 = vadd.f32 %v2271_v23, %v1766_v60  ;;  %v2273_v1 = vpop.f32.mrb[5].mxu0 }
 0x32d   :  { %v4395_v14 = vadd.f32 %v2273_v1, %v1766_v60 }
 0x32e   :  { %2796 = vrot.lane.b32.xlu1 %v4363_v26, %s3272_s19  ;;  %2767 = vrot.lane.b32.xlu0 %v4363_v26, %s3269_s16 }
 0x332   :  { %v2762_v7 = vpop.f32.mrb[4].mxu1 }
 0x333   :  { %v4369_v16 = vadd.f32 %v2762_v7, %v1766_v60  ;;  %v2764_v41 = vpop.f32.mrb[5].mxu1 }
 0x334   :  { %v4401_v43 = vadd.f32 %v2764_v41, %v1766_v60 }
 0x335   :  { %2800 = vrot.lane.b32.xlu1 %v4369_v16, %s3272_s19  ;;  %2771 = vrot.lane.b32.xlu0 %v4369_v16, %s3269_s16 }
 0x339   :  { %2824 = vrot.lane.b32.xlu1 %v4363_v26, %s3268_s3  ;;  %2828 = vrot.lane.b32.xlu0 %v4369_v16, %s3268_s3 }
 0x33d   :  { %2852 = vrot.lane.b32.xlu1 %v4363_v26, %s3273_s20  ;;  %2856 = vrot.lane.b32.xlu0 %v4369_v16, %s3273_s20 }
 0x341   :  { %2892 = vrot.lane.b32.xlu1 %v4363_v26, %s3270_s17  ;;  %2920 = vrot.lane.b32.xlu0 %v4363_v26, %s3274_s21 }
 0x345   :  { %2896 = vrot.lane.b32.xlu1 %v4369_v16, %s3270_s17  ;;  %2924 = vrot.lane.b32.xlu0 %v4369_v16, %s3274_s21 }
 0x349   :  { %2948 = vrot.lane.b32.xlu1 %v4363_v26, %s3275_s22  ;;  %2952 = vrot.lane.b32.xlu0 %v4369_v16, %s3275_s22 }
 0x34d   :  { %2769 = vrot.lane.b32.xlu1 %v4395_v14, %s3269_s16  ;;  %2976 = vrot.lane.b32.xlu0 %v4363_v26, %s3271_s18 }
 0x351   :  { %2773 = vrot.lane.b32.xlu1 %v4401_v43, %s3269_s16  ;;  %2798 = vrot.lane.b32.xlu0 %v4395_v14, %s3272_s19 }
 0x355   :  { %2802 = vrot.lane.b32.xlu1 %v4401_v43, %s3272_s19  ;;  %2894 = vrot.lane.b32.xlu0 %v4395_v14, %s3270_s17 }
 0x359   :  { %2826 = vrot.lane.b32.xlu1 %v4395_v14, %s3268_s3  ;;  %2898 = vrot.lane.b32.xlu0 %v4401_v43, %s3270_s17 }
 0x35d   :  { %2830 = vrot.lane.b32.xlu1 %v4401_v43, %s3268_s3  ;;  %2980 = vrot.lane.b32.xlu0 %v4369_v16, %s3271_s18 }
 0x361   :  { %2854 = vrot.lane.b32.xlu1 %v4395_v14, %s3273_s20  ;;  %3006 = vperm.xlu0 %3203, %v1762_v51  }
 0x365   :  { %2858 = vrot.lane.b32.xlu1 %v4401_v43, %s3273_s20 }
 0x369   :  { %2922 = vrot.lane.b32.xlu1 %v4395_v14, %s3274_s21 }
 0x36d   :  { %2926 = vrot.lane.b32.xlu1 %v4401_v43, %s3274_s21 }
 0x371   :  { %2950 = vrot.lane.b32.xlu1 %v4395_v14, %s3275_s22 }
 0x375   :  { %2954 = vrot.lane.b32.xlu1 %v4401_v43, %s3275_s22 }
 0x379   :  { %2978 = vrot.lane.b32.xlu1 %v4395_v14, %s3271_s18 }
 0x37d   :  { %2982 = vrot.lane.b32.xlu1 %v4401_v43, %s3271_s18 }
 0x3a0   :  { %v2797_v30 = vpop.permute.xlu1 %2796  ;;  %v2768_v34 = vpop.permute.xlu0 %2767 }
 0x3a7   :  { %v2801_v46 = vpop.permute.xlu1 %2800  ;;  %v2772_v2 = vpop.permute.xlu0 %2771 }
 0x3ab   :  { %v2825_v0 = vpop.permute.xlu1 %2824  ;;  %v2829_v57 = vpop.permute.xlu0 %2828 }
 0x3af   :  { %v2853_v63 = vpop.permute.xlu1 %2852  ;;  %v2857_v29 = vpop.permute.xlu0 %2856 }
 0x3b3   :  { %v4456_v33 = vpop.permute.xlu1 %2892  ;;  %v4458_v17 = vpop.permute.xlu0 %2920 }
 0x3b7   :  { %v4460_v22 = vpop.permute.xlu1 %2896  ;;  %v4462_v50 = vpop.permute.xlu0 %2924 }
 0x3bb   :  { %v4464_v62 = vpop.permute.xlu1 %2948  ;;  %v4466_v45 = vpop.permute.xlu0 %2952 }
 0x3bf   :  { %v2770_v28 = vpop.permute.xlu1 %2769  ;;  %v4468_v59 = vpop.permute.xlu0 %2976 }
 0x3c0   :  { %4772 = vst [vmem:[#allocation13_spill] sm:$0xff] %v4468_v59  ;;  %v2776_v52 = vsel %vm1139_vm1, %v2770_v28, %v2772_v2  ;;  %v2777_v6 = vsel %vm1139_vm1, %v2768_v34, %v2770_v28 }
 0x3c1   :  { %v2781_v1 = vmul.f32 %v2776_v52, %v3731_v8 }
 0x3c3   :  { %v2774_v12 = vpop.permute.xlu1 %2773  ;;  %v2799_v38 = vpop.permute.xlu0 %2798  ;;  %v2790_v32 = vmul.f32 %v4454_v15, %v2781_v1  ;;  %v4773_v1 = vld [vmem:[#allocation17_spill] sm:$0xff] }
 0x3c4   :  { %v2805_v10 = vsel %vm1214_vm2, %v2799_v38, %v2801_v46  ;;  %v2778_v20 = vsel %vm1139_vm1, %v2774_v12, %v2768_v34  ;;  %v2780_v59 = vmul.f32 %v2777_v6, %v4773_v1  ;;  %v4775_v6 = vld [vmem:[#allocation21_spill] sm:$0xff] }
 0x3c5   :  { %v2810_v23 = vmul.f32 %v2805_v10, %v3754_v19  ;;  %v2806_v19 = vsel %vm1214_vm2, %v2797_v30, %v2799_v38 }
 0x3c6   :  { %v2809_v38 = vmul.f32 %v2806_v19, %v3751_v18 }
 0x3c7   :  { %v2803_v37 = vpop.permute.xlu1 %2802  ;;  %v2818_v51 = vmul.f32 %v4444_v39, %v2810_v23  ;;  %v2886_v23 = vmul.f32 %v4369_v16, %v4442_v42 }
 0x3c8   :  { %v2807_v25 = vsel %vm1214_vm2, %v2803_v37, %v2797_v30  ;;  %v2779_v30 = vmul.f32 %v2778_v20, %v3759_v35 }
 0x3c9   :  { %v2808_v10 = vmul.f32 %v2807_v25, %v3780_v48  ;;  %v2822_v28 = vadd.f32 %v2818_v51, %v2790_v32  ;;  %v2804_v25 = vsel %vm1214_vm2, %v2801_v46, %v2803_v37  ;;  %v4774_v32 = vld [vmem:[#allocation23_spill] sm:$0xff] }
 0x3cb   :  { %v2827_v21 = vpop.permute.xlu1 %2826  ;;  %v2816_v35 = vmul.f32 %v4444_v39, %v2808_v10 }
 0x3cc   :  { %v2833_v60 = vsel %vm1287_vm3, %v2827_v21, %v2829_v57  ;;  %v2834_v48 = vsel %vm1287_vm3, %v2825_v0, %v2827_v21  ;;  %v4776_v21 = vld [vmem:[#allocation26_spill] sm:$0xff] }
 0x3cd   :  { %v2838_v7 = vmul.f32 %v2833_v60, %v4742_v58  ;;  %v2837_v46 = vmul.f32 %v2834_v48, %v4775_v6 }
 0x3cf   :  { %v2831_v41 = vpop.permute.xlu1 %2830  ;;  %v2846_v8 = vmul.f32 %v4438_v27, %v2838_v7  ;;  %v2895_v7 = vpop.permute.xlu0 %2894 }
 0x3d0   :  { %v2835_v52 = vsel %vm1287_vm3, %v2831_v41, %v2825_v0  ;;  %v2832_v0 = vsel %vm1287_vm3, %v2829_v57, %v2831_v41  ;;  %v4779_v57 = vld [vmem:[#allocation18_spill] sm:$0xff] }
 0x3d1   :  { %v2850_v5 = vadd.f32 %v2846_v8, %v2822_v28  ;;  %v2836_v51 = vmul.f32 %v2835_v52, %v4774_v32  ;;  %v2788_v8 = vmul.f32 %v4454_v15, %v2779_v30  ;;  %v4780_v41 = vld [vmem:[#allocation22_spill] sm:$0xff]  ;;  %v2789_v30 = vmul.f32 %v4454_v15, %v2780_v59 }
 0x3d2   :  { %v2839_v1 = vmul.f32 %v2832_v0, %v4780_v41  ;;  %v2885_v0 = vmul.f32 %v4395_v14, %v4442_v42 }
 0x3d3   :  { %v2855_v58 = vpop.permute.xlu1 %2854  ;;  %v2844_v52 = vmul.f32 %v4438_v27, %v2836_v51  ;;  %v2820_v48 = vadd.f32 %v2816_v35, %v2788_v8  ;;  %v2901_v35 = vsel %vm1457_vm5, %v2895_v7, %v4460_v22 }
 0x3d4   :  { %v2861_v60 = vsel %vm1360_vm4, %v2855_v58, %v2857_v29  ;;  %v2862_v18 = vsel %vm1360_vm4, %v2853_v63, %v2855_v58  ;;  %v4778_v58 = vld [vmem:[#allocation24_spill] sm:$0xff]  ;;  %v2847_v6 = vmul.f32 %v4438_v27, %v2839_v1 }
 0x3d5   :  { %v2866_v34 = vmul.f32 %v2861_v60, %v4746_v24  ;;  %v2775_v24 = vsel %vm1139_vm1, %v2772_v2, %v2774_v12  ;;  %v2817_v2 = vmul.f32 %v4444_v39, %v2809_v38  ;;  %v4777_v12 = vld [vmem:[#allocation19_spill] sm:$0xff]  ;;  %v2865_v60 = vmul.f32 %v2862_v18, %v4778_v58 }
 0x3d6   :  { %v2811_v10 = vmul.f32 %v2804_v25, %v4777_v12  ;;  %v2845_v38 = vmul.f32 %v4438_v27, %v2837_v46  ;;  %v2899_v25 = vpop.permute.xlu0 %2898  ;;  %v2884_v46 = vmul.f32 %v4363_v26, %v4442_v42 }
 0x3d7   :  { %v2874_v16 = vmul.f32 %v4440_v55, %v2866_v34  ;;  %v2859_v9 = vpop.permute.xlu1 %2858  ;;  %v2821_v18 = vadd.f32 %v2817_v2, %v2789_v30  ;;  %v2903_v26 = vsel %vm1457_vm5, %v2899_v25, %v4456_v33 }
 0x3d8   :  { %v2863_v20 = vsel %vm1360_vm4, %v2859_v9, %v2853_v63  ;;  %v2860_v63 = vsel %vm1360_vm4, %v2857_v29, %v2859_v9  ;;  %v2819_v51 = vmul.f32 %v4444_v39, %v2811_v10  ;;  %v2902_v9 = vsel %vm1457_vm5, %v4456_v33, %v2895_v7 }
 0x3d9   :  { %v2878_v37 = vadd.f32 %v2874_v16, %v2850_v5  ;;  %v2864_v19 = vmul.f32 %v2863_v20, %v4776_v21  ;;  %v2782_v5 = vmul.f32 %v2775_v24, %v4779_v57  ;;  %v2848_v29 = vadd.f32 %v2844_v52, %v2820_v48  ;;  %v4782_v48 = vld [vmem:[#allocation31_spill] sm:$0xff] }
 0x3da   :  { %v2873_v24 = vmul.f32 %v4440_v55, %v2865_v60  ;;  %v2900_v39 = vsel %vm1457_vm5, %v4460_v22, %v2899_v25  ;;  %v2905_v22 = vmul.f32 %v2901_v35, %v3875_v47  ;;  %v2907_v60 = vmul.f32 %v2903_v26, %v3902_v31  ;;  %v2981_v25 = vpop.permute.xlu0 %2980 }
 0x3db   :  { %v4523_v28 = vadd.f32 %v2886_v23, %v2878_v37  ;;  %v2923_v34 = vpop.permute.xlu1 %2922  ;;  %v2872_v32 = vmul.f32 %v4440_v55, %v2864_v19  ;;  %v4781_v23 = vld [vmem:[#allocation27_spill] sm:$0xff]  ;;  %v2791_v59 = vmul.f32 %v4454_v15, %v2782_v5  ;;  %v2849_v37 = vadd.f32 %v2845_v38, %v2821_v18 }
 0x3dc   :  { %v2867_v16 = vmul.f32 %v2860_v63, %v4781_v23  ;;  %v2904_v15 = vmul.f32 %v2902_v9, %v3886_v36  ;;  %v2929_v7 = vsel %vm1530_vm6, %v2923_v34, %v4462_v50  ;;  %v2906_v27 = vmul.f32 %v2900_v39, %v3897_v53  ;;  %v4785_v39 = vld [vmem:[#allocation37_spill] sm:$0xff] }
 0x3dd   :  { %v2876_v21 = vadd.f32 %v2872_v32, %v2848_v29  ;;  %v2823_v19 = vadd.f32 %v2819_v51, %v2791_v59  ;;  %v2877_v14 = vadd.f32 %v2873_v24, %v2849_v37  ;;  %v2930_v36 = vsel %vm1530_vm6, %v4458_v17, %v2923_v34  ;;  %v4783_v51 = vld [vmem:[#allocation11_spill] sm:$0xff]  ;;  %v4784_v29 = vld [vmem:[#allocation13_spill] sm:$0xff]  ;;  %v3204_v59 = vld [vmem:[%s4638_s1 + $0x20] ss:$0 sm:$0xff]  ;;  %s3276_s1 = smov [#allocation5]  }
 0x3de   :  { %v2875_v8 = vmul.f32 %v4440_v55, %v2867_v16  ;;  %v2933_v33 = vmul.f32 %v2929_v7, %v3925_v40  ;;  %v2912_v58 = vmul.f32 %v4446_v49, %v2904_v15  ;;  %v2887_v63 = vmul.f32 %v4401_v43, %v4442_v42  ;;  %v4786_v15 = vld [vmem:[#allocation25_spill] sm:$0xff]  ;;  %s3027_s17 = sshll.u32 %s3276_s1, 4  ;;  %s3028_s17 = int_to_ptr.vmem [resolvable:$true] %s3027_s17 }
 0x3df   :  { %v2927_v20 = vpop.permute.xlu1 %2926  ;;  %v2851_v12 = vadd.f32 %v2847_v6, %v2823_v19  ;;  %v2888_v10 = vadd.f32 %v2884_v46, %v2876_v21  ;;  %v2889_v57 = vadd.f32 %v2885_v0, %v2877_v14  ;;  %v2932_v5 = vmul.f32 %v2930_v36, %v3920_v56  ;;  %v4787_v36 = vld [vmem:[#allocation20_spill] sm:$0xff]  ;;  %s3231_s18 = scalar_lea.vmem %s3028_s17, 512  ;;  %p3236_p9 = scmp.lt.s32.totalorder %s3028_s17, %s3028_s17 }
 0x3e0   :  { %v2928_v53 = vsel %vm1530_vm6, %v4462_v50, %v2927_v20  ;;  %v2931_v52 = vsel %vm1530_vm6, %v2927_v20, %v4458_v17  ;;  %v2913_v42 = vmul.f32 %v4446_v49, %v2905_v22  ;;  %v2914_v56 = vmul.f32 %v4446_v49, %v2906_v27  ;;  %p3232_p8 = scmp.ne.s32.totalorder %s3028_s17, %s3231_s18  ;;  %p3237_p10 = scmp.lt.s32.totalorder %s3231_s18, %s3231_s18 }
 0x3e1   :  { %v2879_v34 = vadd.f32 %v2875_v8, %v2851_v12  ;;  %v2934_v1 = vmul.f32 %v2928_v53, %v3928_v11  ;;  %v2935_v17 = vmul.f32 %v2931_v52, %v3942_v54  ;;  %v2915_v30 = vmul.f32 %v4446_v49, %v2907_v60 }
 0x3e2   :  { %v2940_v32 = vmul.f32 %v4448_v3, %v2932_v5  ;;  %v2918_v46 = vadd.f32 %v2914_v56, %v4523_v28  ;;  %p3238_p11 = por %p3237_p10, %p3236_p9 }
 0x3e3   :  { %v2951_v2 = vpop.permute.xlu1 %2950  ;;  %v2891_v11 = vadd.f32 %v2887_v63, %v2879_v34  ;;  %v2942_v18 = vmul.f32 %v4448_v3, %v2934_v1  ;;  %v2943_v9 = vmul.f32 %v4448_v3, %v2935_v17 }
 0x3e4   :  { %v2957_v55 = vsel %vm1603_vm7, %v2951_v2, %v4466_v45  ;;  %v2958_v47 = vsel %vm1603_vm7, %v4464_v62, %v2951_v2  ;;  %p3239_p12 = pnand %p3238_p11, %p3232_p8 }
 0x3e5   :  { %v2960_v40 = vmul.f32 %v2958_v47, %v4751_v4  ;;  %v2961_v41 = vmul.f32 %v2957_v55, %v4752_v13  ;;  %v2916_v4 = vadd.f32 %v2912_v58, %v2888_v10  ;;  %v2941_v13 = vmul.f32 %v4448_v3, %v2933_v33  ;;  %v4788_v47 = vld [vmem:[#allocation8_spill] sm:$0xff]  ;;  %v3007_v33 = vpop.permute.xlu0 %3006 }
 0x3e6   :  { %v2919_v0 = vadd.f32 %v2915_v30, %v2891_v11  ;;  %v2946_v26 = vadd.f32 %v2942_v18, %v2918_v46 }
 0x3e7   :  { %v2955_v50 = vpop.permute.xlu1 %2954  ;;  %v2969_v23 = vmul.f32 %v4783_v51, %v2961_v41  ;;  %v2944_v24 = vadd.f32 %v2940_v32, %v2916_v4  ;;  %v3206_v41 = vld [vmem:[#allocation2 + $0x8] sm:$0xff] }
 0x3e8   :  { %v2956_v31 = vsel %vm1603_vm7, %v4466_v45, %v2955_v50  ;;  %v2959_v43 = vsel %vm1603_vm7, %v2955_v50, %v4464_v62  ;;  %v2917_v45 = vadd.f32 %v2913_v42, %v2889_v57  ;;  %v2968_v62 = vmul.f32 %v4783_v51, %v2960_v40  ;;  %v3205_v40 = vld [vmem:[#allocation2] sm:$0xff]  ;;  %v3208_v42 = vld [vmem:[#allocation2 + $0x18] sm:$0xff] }
 0x3e9   :  { %v2962_v54 = vmul.f32 %v2956_v31, %v4753_v44  ;;  %v2963_v38 = vmul.f32 %v2959_v43, %v4782_v48  ;;  %v2947_v27 = vadd.f32 %v2943_v9, %v2919_v0  ;;  %v3207_v31 = vld [vmem:[#allocation2 + $0x10] sm:$0xff] }
 0x3ea   :  { %v2945_v20 = vadd.f32 %v2941_v13, %v2917_v45  ;;  %v2972_v21 = vadd.f32 %v2968_v62, %v2944_v24 }
 0x3eb   :  { %v2979_v16 = vpop.permute.xlu1 %2978  ;;  %v2970_v3 = vmul.f32 %v4783_v51, %v2962_v54  ;;  %v2971_v37 = vmul.f32 %v4783_v51, %v2963_v38 }
 0x3ec   :  { %v2985_v49 = vsel %vm1676_vm8, %v2979_v16, %v2981_v25  ;;  %v2986_v44 = vsel %vm1676_vm8, %v4784_v29, %v2979_v16  ;;  %v2973_v19 = vadd.f32 %v2969_v23, %v2945_v20 }
 0x3ed   :  { %v2988_v35 = vmul.f32 %v3204_v59, %v2986_v44  ;;  %v2989_v6 = vmul.f32 %v4785_v39, %v2985_v49  ;;  %v2974_v53 = vadd.f32 %v2970_v3, %v2946_v26  ;;  %v2975_v52 = vadd.f32 %v2971_v37, %v2947_v27 }
 0x3ef   :  { %v2996_v8 = vmul.f32 %v4786_v15, %v2988_v35  ;;  %v2997_v7 = vmul.f32 %v4786_v15, %v2989_v6  ;;  %v2983_v22 = vpop.permute.xlu1 %2982 }
 0x3f0   :  { %v2984_v14 = vsel %vm1676_vm8, %v2981_v25, %v2983_v22  ;;  %v2987_v28 = vsel %vm1676_vm8, %v2983_v22, %v4784_v29 }
 0x3f1   :  { %v3000_v2 = vadd.f32 %v2996_v8, %v2972_v21  ;;  %v3001_v12 = vadd.f32 %v2997_v7, %v2973_v19  ;;  %v2990_v55 = vmul.f32 %v4787_v36, %v2984_v14  ;;  %v2991_v10 = vmul.f32 %v4788_v47, %v2987_v28 }
 0x3f3   :  { %v3009_v58 = vadd.f32 %v3007_v33, %v3000_v2  ;;  %v3010_v60 = vadd.f32 %v3007_v33, %v3001_v12  ;;  %v2998_v63 = vmul.f32 %v4786_v15, %v2990_v55  ;;  %v2999_v34 = vmul.f32 %v4786_v15, %v2991_v10 }
 0x3f5   :  { %v3002_v57 = vadd.f32 %v2998_v63, %v2974_v53  ;;  %v3003_v5 = vadd.f32 %v2999_v34, %v2975_v52  ;;  %v3013_v61 = vadd.f32 %v3205_v40, %v3009_v58  ;;  %v3014_v50 = vadd.f32 %v3206_v41, %v3010_v60 }
 0x3f7   :  { %v3011_v1 = vadd.f32 %v3007_v33, %v3002_v57  ;;  %v3012_v17 = vadd.f32 %v3007_v33, %v3003_v5  ;;  %3017 = vst [vmem:[#allocation5] sm:$0xff] %v3013_v61  ;;  %3018 = vst [vmem:[#allocation5 + $0x8] sm:$0xff] %v3014_v50 }
 0x3f9   :  { %v3015_v43 = vadd.f32 %v3207_v31, %v3011_v1  ;;  %v3016_v56 = vadd.f32 %v3208_v42, %v3012_v17 }
 0x3fb   :  { %3019 = vst [vmem:[#allocation5 + $0x10] sm:$0xff] %v3015_v43  ;;  %3020 = vst [vmem:[#allocation5 + $0x18] sm:$0xff] %v3016_v56 }
 0x3fc   :  { %3242 = shalt.err (!%p3239_p12)
}
 0x3fd   :  { %s3243_s21 = scalar_lea.hbm %s4647_s10, 512 }
 0x3fe   :  { %p3244_p13 = scmp.ne.s32.totalorder %s4647_s10, %s3243_s21  ;;  %p3247_p0 = scmp.lt.u32.totalorder %s3243_s21, %s4647_s10 }
 0x400   :  { %p3249_p1 = pnand %p3247_p0, %p3244_p13 }
 0x402   :  { %3252 = shalt.err (!%p3249_p1)
}
 0x403   :  { %3030 = dma.vmem_to_hbm [thread:$0]  %s3028_s17, 512, %s4647_s10, [#allocation4]  }
 0x404   :  { %3255 = dma.done.wait [#allocation4], 512  }
 0x405   :  { %3256 = vsyncadd [#allocation4], 4294966784 }
 0x406   :  { %3034 = vsyncpa [#allocation3], 1 }
 0x407   :  { %3035 = vsyncpa [#allocation4], 1 }

</bundles_post_ra>
